<compile_context>
chip_gen: v7x
topology: tpu7x:2x2x1
jax: 0.10.0
libtpu: 0.0.40
codegen_flags: <defaults>
</compile_context>

<pallas_src>
import functools

import jax
import jax.numpy as jnp
from jax import lax
from jax.experimental import pallas as pl
from jax.experimental.pallas import tpu as pltpu


def ppa_kernel(x_ref, pp_ref, wq_ref, bq_ref, wk_ref, bk_ref, gamma_ref, out_ref,
               *, tq, fast):
    # x_ref/pp_ref : (1, C, HW)   wq/wk : (Cq, C)   bq/bk : (Cq, 1)
    # gamma_ref    : (1,) in SMEM          out_ref : (1, C, Tq)
    col0 = pl.multiple_of(pl.program_id(1) * tq, tq)

    x_full = x_ref[0]                                     # (C, HW)
    pp_full = pp_ref[0]                                   # (C, HW)

    # Key projection over all positions (needed for the softmax denominator).
    k_t = jnp.dot(wk_ref[...], x_full,
                  preferred_element_type=jnp.float32) + bk_ref[...]          # (Cq, HW)
    # Query projection only for this query tile.
    x_q = x_ref[0, :, pl.ds(col0, tq)]                                        # (C, Tq)
    q_t = jnp.dot(wq_ref[...], x_q,
                  preferred_element_type=jnp.float32) + bq_ref[...]          # (Cq, Tq)

    # energy_t[j, i] = k[:, j] . q[:, i]  -- keys on sublanes, queries on lanes.
    energy_t = lax.dot_general(k_t, q_t, (((0,), (0,)), ((), ())),
                               preferred_element_type=jnp.float32)            # (HW, Tq)

    # Numerically stable softmax over keys (axis 0); normalization fused into output.
    m = jnp.max(energy_t, axis=0, keepdims=True)                              # (1, Tq)
    p = jnp.exp(energy_t - m)                                                 # (HW, Tq)
    l = jnp.sum(p, axis=0, keepdims=True)                                     # (1, Tq)

    if fast:
        p_mm = p.astype(jnp.bfloat16)
        pp_mm = pp_full.astype(jnp.bfloat16)
    else:
        p_mm = p
        pp_mm = pp_full

    # out[c, i] = sum_j pp[c, j] * attention[i, j]   (== bmm(value, att^T))
    o = jnp.dot(pp_mm, p_mm, preferred_element_type=jnp.float32)              # (C, Tq)

    scale = gamma_ref[0] * pl.reciprocal(l, approx=fast)                      # (1, Tq)
    pp_q = pp_ref[0, :, pl.ds(col0, tq)]                                      # (C, Tq)
    out_ref[0] = (o * scale + pp_q.astype(jnp.float32)).astype(out_ref.dtype)


def _pick_tq(hw):
    for t in (512, 256, 128):
        if hw % t == 0:
            return t
    return hw  # fallback: whole spatial extent in one tile


def ppa_forward(x, pp_feat, wq, bq, wk, bk, gamma, *, tq=None, fast=True):
    """x, pp_feat: (B, C, H, W) NCHW.  wq/wk: (C//8, C, 1, 1).  bq/bk: (C//8,).  gamma: (1,)."""
    B, C, H, W = x.shape
    HW = H * W
    Cq = wq.shape[0]
    if tq is None:
        tq = _pick_tq(HW)
    assert HW % tq == 0
    n_q = HW // tq

    # NCHW is already channel-major / spatial-last: pure reshapes, no transposes.
    x_flat = x.reshape(B, C, HW)
    pp_flat = pp_feat.reshape(B, C, HW)
    wq_m = wq.reshape(Cq, C)
    wk_m = wk.reshape(Cq, C)
    bq_m = bq.reshape(Cq, 1)
    bk_m = bk.reshape(Cq, 1)
    gamma_m = gamma.reshape(1).astype(jnp.float32)

    kernel = functools.partial(ppa_kernel, tq=tq, fast=fast)

    out_flat = pl.pallas_call(
        kernel,
        out_shape=jax.ShapeDtypeStruct((B, C, HW), x.dtype),
        grid_spec=pltpu.PrefetchScalarGridSpec(
            num_scalar_prefetch=0,
            grid=(B, n_q),
            in_specs=[
                pl.BlockSpec((1, C, HW), lambda b, q: (b, 0, 0)),   # x (whole image)
                pl.BlockSpec((1, C, HW), lambda b, q: (b, 0, 0)),   # pp_feat (value)
                pl.BlockSpec((Cq, C), lambda b, q: (0, 0)),         # Wq
                pl.BlockSpec((Cq, 1), lambda b, q: (0, 0)),         # bq
                pl.BlockSpec((Cq, C), lambda b, q: (0, 0)),         # Wk
                pl.BlockSpec((Cq, 1), lambda b, q: (0, 0)),         # bk
                pl.BlockSpec(memory_space=pltpu.MemorySpace.SMEM),  # gamma (scalar)
            ],
            out_specs=pl.BlockSpec((1, C, tq), lambda b, q: (b, 0, q)),
        ),
        compiler_params=pltpu.CompilerParams(
            dimension_semantics=("parallel", "parallel")),
    )(x_flat, pp_flat, wq_m, bq_m, wk_m, bk_m, gamma_m)

    return out_flat.reshape(B, C, H, W)


def ppa_reference(x, pp_feat, wq, bq, wk, bk, gamma):
    """Pure-JAX transcription of the PyTorch forward (for verification)."""
    B, C, H, W = x.shape
    HW = H * W
    Cq = wq.shape[0]
    wq2 = wq.reshape(Cq, C)
    wk2 = wk.reshape(Cq, C)
    proj_q = jnp.einsum('oc,bchw->bohw', wq2, x).reshape(B, Cq, HW) + bq[None, :, None]
    proj_k = jnp.einsum('oc,bchw->bohw', wk2, x).reshape(B, Cq, HW) + bk[None, :, None]
    proj_q = proj_q.transpose(0, 2, 1)                       # (B, HW, Cq)
    energy = jnp.einsum('bic,bcj->bij', proj_q, proj_k)      # (B, HW, HW)
    attention = jax.nn.softmax(energy, axis=-1)
    proj_value = pp_feat.reshape(B, C, HW)
    out = jnp.einsum('bcj,bij->bci', proj_value, attention)  # bmm(value, att^T)
    out = out.reshape(B, C, H, W)
    return gamma[0] * out + pp_feat


if __name__ == "__main__":
    key = jax.random.PRNGKey(0)
    B, C, H, W = 2, 32, 16, 16          # in_dim = 32 -> query/key dim = 4
    Cq = C // 8

    k1, k2, k3, k4, k5, k6 = jax.random.split(key, 6)
    x = jax.random.normal(k1, (B, C, H, W), dtype=jnp.float32)
    pp_feat = jax.random.normal(k2, (B, C, H, W), dtype=jnp.float32)

    wq = jax.random.normal(k3, (Cq, C, 1, 1), dtype=jnp.float32) * 0.1
    bq = jax.random.normal(k4, (Cq,), dtype=jnp.float32) * 0.1
    wk = jax.random.normal(k5, (Cq, C, 1, 1), dtype=jnp.float32) * 0.1
    bk = jax.random.normal(k6, (Cq,), dtype=jnp.float32) * 0.1
    # Module __init__ uses gamma = zeros(1); use a non-zero value so the attention
    # path contributes and can be checked numerically.
    gamma = jnp.array([0.5], dtype=jnp.float32)

    ref = ppa_reference(x, pp_feat, wq, bq, wk, bk, gamma)

    # Fast path (bf16 MXU operands for the value matmul + approx reciprocal).
    out_fast = ppa_forward(x, pp_feat, wq, bq, wk, bk, gamma, fast=True)
    jax.block_until_ready(out_fast)
    assert out_fast.shape == (B, C, H, W)
    assert jnp.allclose(out_fast, ref, atol=5e-2, rtol=5e-2), \
        float(jnp.max(jnp.abs(out_fast - ref)))

    # Exact f32 path (validates the math tightly).
    out_exact = ppa_forward(x, pp_feat, wq, bq, wk, bk, gamma, fast=False)
    jax.block_until_ready(out_exact)
    assert jnp.allclose(out_exact, ref, atol=1e-4, rtol=1e-4), \
        float(jnp.max(jnp.abs(out_exact - ref)))

    # gamma = 0 (the module's actual init): output must equal pp_feat exactly.
    out0 = ppa_forward(x, pp_feat, wq, bq, wk, bk, jnp.zeros((1,), jnp.float32), fast=True)
    jax.block_until_ready(out0)
    assert jnp.allclose(out0, pp_feat, atol=1e-6)

    print("KERNEL_OK")
</pallas_src>

<mosaic_0001>
module attributes {stable_mosaic.version = 11 : i64} {
  func.func @ppa_kernel(%arg0: i32, %arg1: i32, %arg2: memref<1x32x256xf32, #tpu.memory_space<vmem>>, %arg3: memref<1x32x256xf32, #tpu.memory_space<vmem>>, %arg4: memref<4x32xf32, #tpu.memory_space<vmem>>, %arg5: memref<4x1xf32, #tpu.memory_space<vmem>>, %arg6: memref<4x32xf32, #tpu.memory_space<vmem>>, %arg7: memref<4x1xf32, #tpu.memory_space<vmem>>, %arg8: memref<1xf32, #tpu.memory_space<smem>>, %arg9: memref<1x32x256xf32, #tpu.memory_space<vmem>>) attributes {dimension_semantics = [#tpu.dimension_semantics<parallel>, #tpu.dimension_semantics<parallel>], iteration_bounds = array<i64: 2, 1>, scalar_prefetch = 0 : i64, scratch_operands = 0 : i64, tpu.core_type = #tpu.core_type<tc>, window_params = [{transform_indices = @transform_0, window_bounds = array<i64: 1, 32, 256>}, {transform_indices = @transform_1, window_bounds = array<i64: 1, 32, 256>}, {pipeline_mode = #tpu.pipeline_mode<synchronous>, transform_indices = @transform_2, window_bounds = array<i64: 4, 32>}, {pipeline_mode = #tpu.pipeline_mode<synchronous>, transform_indices = @transform_3, window_bounds = array<i64: 4, 1>}, {pipeline_mode = #tpu.pipeline_mode<synchronous>, transform_indices = @transform_4, window_bounds = array<i64: 4, 32>}, {pipeline_mode = #tpu.pipeline_mode<synchronous>, transform_indices = @transform_5, window_bounds = array<i64: 4, 1>}, {transform_indices = @transform_6, window_bounds = array<i64: 1>}, {transform_indices = @transform_7, window_bounds = array<i64: 1, 32, 256>}]} {
    %c256_i32 = arith.constant 256 : i32
    %0 = arith.muli %arg1, %c256_i32 : i32
    %1 = tpu.assume_multiple %0, 256 : i32
    %c0 = arith.constant 0 : index
    %c0_0 = arith.constant 0 : index
    %c0_1 = arith.constant 0 : index
    %2 = vector.load %arg2[%c0, %c0_0, %c0_1] : memref<1x32x256xf32, #tpu.memory_space<vmem>>, vector<1x32x256xf32>
    %3 = vector.shape_cast %2 : vector<1x32x256xf32> to vector<32x256xf32>
    %c0_2 = arith.constant 0 : index
    %c0_3 = arith.constant 0 : index
    %c0_4 = arith.constant 0 : index
    %4 = vector.load %arg3[%c0_2, %c0_3, %c0_4] : memref<1x32x256xf32, #tpu.memory_space<vmem>>, vector<1x32x256xf32>
    %5 = vector.shape_cast %4 : vector<1x32x256xf32> to vector<32x256xf32>
    %c0_5 = arith.constant 0 : index
    %c0_6 = arith.constant 0 : index
    %6 = vector.load %arg6[%c0_5, %c0_6] : memref<4x32xf32, #tpu.memory_space<vmem>>, vector<4x32xf32>
    %cst = arith.constant dense<0.000000e+00> : vector<4x256xf32>
    %7 = tpu.matmul %6, %3, %cst {dimension_numbers = #tpu.dot_dimension_numbers<[1], [0], [0], [1], [0, 0, 1, 1], [], []>} : vector<4x32xf32>, vector<32x256xf32>, vector<4x256xf32> -> vector<4x256xf32>
    %c0_7 = arith.constant 0 : index
    %c0_8 = arith.constant 0 : index
    %8 = vector.load %arg7[%c0_7, %c0_8] : memref<4x1xf32, #tpu.memory_space<vmem>>, vector<4x1xf32>
    %9 = vector.broadcast %8 : vector<4x1xf32> to vector<4x256xf32>
    %10 = arith.addf %7, %9 : vector<4x256xf32>
    %c0_9 = arith.constant 0 : index
    %c0_10 = arith.constant 0 : index
    %11 = arith.index_cast %1 : i32 to index
    %12 = vector.load %arg2[%c0_9, %c0_10, %11] : memref<1x32x256xf32, #tpu.memory_space<vmem>>, vector<1x32x256xf32>
    %13 = vector.shape_cast %12 : vector<1x32x256xf32> to vector<32x256xf32>
    %c0_11 = arith.constant 0 : index
    %c0_12 = arith.constant 0 : index
    %14 = vector.load %arg4[%c0_11, %c0_12] : memref<4x32xf32, #tpu.memory_space<vmem>>, vector<4x32xf32>
    %cst_13 = arith.constant dense<0.000000e+00> : vector<4x256xf32>
    %15 = tpu.matmul %14, %13, %cst_13 {dimension_numbers = #tpu.dot_dimension_numbers<[1], [0], [0], [1], [0, 0, 1, 1], [], []>} : vector<4x32xf32>, vector<32x256xf32>, vector<4x256xf32> -> vector<4x256xf32>
    %c0_14 = arith.constant 0 : index
    %c0_15 = arith.constant 0 : index
    %16 = vector.load %arg5[%c0_14, %c0_15] : memref<4x1xf32, #tpu.memory_space<vmem>>, vector<4x1xf32>
    %17 = vector.broadcast %16 : vector<4x1xf32> to vector<4x256xf32>
    %18 = arith.addf %15, %17 : vector<4x256xf32>
    %cst_16 = arith.constant dense<0.000000e+00> : vector<256x256xf32>
    %19 = tpu.matmul %10, %18, %cst_16 {dimension_numbers = #tpu.dot_dimension_numbers<[0], [0], [1], [1], [0, 1, 1, 1], [], []>} : vector<4x256xf32>, vector<4x256xf32>, vector<256x256xf32> -> vector<256x256xf32>
    %cst_17 = arith.constant dense<0xFF800000> : vector<256xf32>
    %20 = vector.multi_reduction <maximumf>, %19, %cst_17 [0] : vector<256x256xf32> to vector<256xf32>
    %21 = vector.shape_cast %20 : vector<256xf32> to vector<1x256xf32>
    %22 = vector.broadcast %21 : vector<1x256xf32> to vector<256x256xf32>
    %23 = arith.subf %19, %22 : vector<256x256xf32>
    %24 = math.exp %23 : vector<256x256xf32>
    %cst_18 = arith.constant dense<0.000000e+00> : vector<256xf32>
    %25 = vector.multi_reduction <add>, %24, %cst_18 [0] : vector<256x256xf32> to vector<256xf32>
    %26 = vector.shape_cast %25 : vector<256xf32> to vector<1x256xf32>
    %27 = arith.truncf %24 : vector<256x256xf32> to vector<256x256xbf16>
    %28 = arith.truncf %5 : vector<32x256xf32> to vector<32x256xbf16>
    %cst_19 = arith.constant dense<0.000000e+00> : vector<32x256xf32>
    %29 = tpu.matmul %28, %27, %cst_19 {dimension_numbers = #tpu.dot_dimension_numbers<[1], [0], [0], [1], [0, 0, 1, 1], [], []>} : vector<32x256xbf16>, vector<256x256xbf16>, vector<32x256xf32> -> vector<32x256xf32>
    %c0_20 = arith.constant 0 : index
    %30 = memref.load %arg8[%c0_20] : memref<1xf32, #tpu.memory_space<smem>>
    %31 = tpu.reciprocal %26 {approx = true} : vector<1x256xf32> -> vector<1x256xf32>
    %32 = vector.broadcast %30 : f32 to vector<1x256xf32>
    %33 = arith.mulf %32, %31 : vector<1x256xf32>
    %c0_21 = arith.constant 0 : index
    %c0_22 = arith.constant 0 : index
    %34 = arith.index_cast %1 : i32 to index
    %35 = vector.load %arg3[%c0_21, %c0_22, %34] : memref<1x32x256xf32, #tpu.memory_space<vmem>>, vector<1x32x256xf32>
    %36 = vector.shape_cast %35 : vector<1x32x256xf32> to vector<32x256xf32>
    %37 = vector.broadcast %33 : vector<1x256xf32> to vector<32x256xf32>
    %38 = arith.mulf %29, %37 : vector<32x256xf32>
    %39 = arith.addf %38, %36 : vector<32x256xf32>
    %c0_23 = arith.constant 0 : index
    %c0_24 = arith.constant 0 : index
    %c0_25 = arith.constant 0 : index
    %40 = vector.load %arg9[%c0_23, %c0_24, %c0_25] : memref<1x32x256xf32, #tpu.memory_space<vmem>>, vector<1x32x256xf32>
    %41 = vector.shape_cast %40 : vector<1x32x256xf32> to vector<32x256xf32>
    %42 = vector.shape_cast %39 : vector<32x256xf32> to vector<1x32x256xf32>
    tpu.vector_store %arg9[%c0_23, %c0_24, %c0_25], %42 {strides = array<i32>} : memref<1x32x256xf32, #tpu.memory_space<vmem>>, vector<1x32x256xf32>,
    return
  }
  func.func @transform_0(%arg0: i32, %arg1: i32) -> (i32, i32, i32) {
    %c0_i32 = arith.constant 0 : i32
    %c0_i32_0 = arith.constant 0 : i32
    %c0_i32_1 = arith.constant 0 : i32
    return %arg0, %c0_i32, %c0_i32_0 : i32, i32, i32
  }
  func.func @transform_1(%arg0: i32, %arg1: i32) -> (i32, i32, i32) {
    %c0_i32 = arith.constant 0 : i32
    %c0_i32_0 = arith.constant 0 : i32
    %c0_i32_1 = arith.constant 0 : i32
    return %arg0, %c0_i32, %c0_i32_0 : i32, i32, i32
  }
  func.func @transform_2(%arg0: i32, %arg1: i32) -> (i32, i32) {
    %c0_i32 = arith.constant 0 : i32
    %c0_i32_0 = arith.constant 0 : i32
    %c0_i32_1 = arith.constant 0 : i32
    return %c0_i32, %c0_i32_0 : i32, i32
  }
  func.func @transform_3(%arg0: i32, %arg1: i32) -> (i32, i32) {
    %c0_i32 = arith.constant 0 : i32
    %c0_i32_0 = arith.constant 0 : i32
    %c0_i32_1 = arith.constant 0 : i32
    return %c0_i32, %c0_i32_0 : i32, i32
  }
  func.func @transform_4(%arg0: i32, %arg1: i32) -> (i32, i32) {
    %c0_i32 = arith.constant 0 : i32
    %c0_i32_0 = arith.constant 0 : i32
    %c0_i32_1 = arith.constant 0 : i32
    return %c0_i32, %c0_i32_0 : i32, i32
  }
  func.func @transform_5(%arg0: i32, %arg1: i32) -> (i32, i32) {
    %c0_i32 = arith.constant 0 : i32
    %c0_i32_0 = arith.constant 0 : i32
    %c0_i32_1 = arith.constant 0 : i32
    return %c0_i32, %c0_i32_0 : i32, i32
  }
  func.func @transform_6(%arg0: i32, %arg1: i32) -> i32 {
    %c0_i32 = arith.constant 0 : i32
    %c0_i32_0 = arith.constant 0 : i32
    return %c0_i32 : i32
  }
  func.func @transform_7(%arg0: i32, %arg1: i32) -> (i32, i32, i32) {
    %c0_i32 = arith.constant 0 : i32
    %c0_i32_0 = arith.constant 0 : i32
    return %arg0, %c0_i32, %arg1 : i32, i32, i32
  }
}

</mosaic_0001>

<bundles_post_ra>
// kernel: tpu_custom_call.1
= control target key start
LH: loop header
LB: loop body
LE: loop exit
PB: predicated region body
PF: predicated region fallthrough
CT: control target
= control target key end

     0   :  { %s3016_s0 = inlined_call_operand.hbm [shape: f32[2,32,256], index: 0, kind: input, shape index: {}]   ;;  %s3017_s1 = inlined_call_operand.hbm [shape: f32[2,32,256], index: 1, kind: input, shape index: {}]   ;;  %s3018_s2 = inlined_call_operand.vmem [shape: f32[4,32], index: 2, kind: input, shape index: {}]   ;;  %s3019_s3 = inlined_call_operand.vmem [shape: f32[4,1], index: 3, kind: input, shape index: {}]   ;;  %s3020_s4 = inlined_call_operand.vmem [shape: f32[4,32], index: 4, kind: input, shape index: {}]   ;;  %s3021_s5 = inlined_call_operand.vmem [shape: f32[4,1], index: 5, kind: input, shape index: {}]   ;;  %s3022_s6 = inlined_call_operand.<no memory space> [shape: f32[1], index: 6, kind: input, shape index: {}]   ;;  %s3023_s7 = inlined_call_operand.hbm [shape: f32[2,32,256], index: 7, kind: output, shape index: {}]  }
   0x1   :  { %3073 = sst [smem:[#allocation34_spill]] %s3016_s0 }
   0x2   :  { %12 = sst [smem:[#allocation2]] %s3022_s6 }
   0x3   :  { %13 = vsyncpa [#allocation4], 0 }
   0x4   :  { %15 = vsyncpa [#allocation4 + $0x1], 0 }
   0x5   :  { %16 = vsyncpa [#allocation7], 0 }
   0x6   :  { %18 = vsyncpa [#allocation7 + $0x1], 0 }
   0x7   :  { %19 = vsyncpa [#allocation5], 0 }
   0x8   :  { %21 = vsyncpa [#allocation5 + $0x1], 0  ;;  %s2046_s26 = smov 0   ;;  %s2048_s27 = smov 0  }
   0x9   :  { %s2050_s28 = smov 0   ;;  %s2052_s29 = smov 0  }
   0xa   :  { %s2054_s30 = smov 0   ;;  %s2056_s8 = smov 0  }
   0xb LB: > { %s1566_s6 = sadd.s32 4294967295, %s1992_s8   ;;  %s1567_s9 = sadd.s32 4294967294, %s1992_s8   ;;  %s1992_s8 = sphi %s2056_s8, %s27_s8   ;;  %s1988_s30 = sphi %s2054_s30, %s3200_s30   ;;  %s1984_s29 = sphi %s2052_s29, %s3199_s29   ;;  %s1980_s28 = sphi %s2050_s28, %s3198_s28   ;;  %s1976_s27 = sphi %s2048_s27, %s3197_s27   ;;  %s1972_s26 = sphi %s2046_s26, %s3196_s26  }
   0xc   : > { %s39_s10 = sadd.s32 1, %s1988_s30  ;;  %s46_s11 = sadd.s32 1, %s1980_s28 }
   0xd   : > { %p41_p0 = scmp.ge.s32.totalorder %s39_s10, 2  ;;  %p53_p1 = scmp.ne.s32.totalorder %s1980_s28, %s1976_s27 }
   0xe   : > { %p54_p2 = scmp.eq.s32.totalorder %s1992_s8, 0  ;;  %p59_p3 = scmp.ne.s32.totalorder %s1976_s27, %s1972_s26 }
   0xf   : > { %s3202_s10 = smov (%p41_p0, %s39_s10), 0  ;;  %p60_p5 = scmp.eq.s32.totalorder %s1566_s6, 0 }
  0x10   : > { %3074 = sst [smem:[#allocation12_spill]] %s3202_s10  ;;  %p2087_p4 = por %p54_p2, %p53_p1 }
  0x11   : > { %s43_s13 = ssub.s32 %s1988_s30, %s3202_s10  ;;  %p216_p6 = scmp.eq.s32.totalorder %s1566_s6, 1 }
  0x12   : > { %p44_p7 = scmp.eq.s32.totalorder %s43_s13, 0  ;;  %p2093_p8 = por %p60_p5, %p59_p3 }
  0x13   : > { %p2097_p9 = por %p216_p6, %p53_p1  ;;  %p222_p10 = scmp.eq.s32.totalorder %s1567_s9, 1 }
  0x14   : > { %s3076_s14 = scalar_select %p2093_p8, 1, 0 }
  0x15   : > { %s3077_s15 = scalar_select %p2097_p9, 1, 0 }
  0x16   : > { %s2102_s16 = scalar_select %p44_p7, %s1980_s28, %s46_s11  }
  0x17   : > { %p2104_p11 = por %p222_p10, %p59_p3  ;;  %p1657_p13 = scmp.lt.s32.totalorder %s1992_s8, 2 }
  0x18   : > { %s2111_s18 = sand.u32 1, %s1980_s28   ;;  %s1621_s20 = sshll.u32 %s1988_s30, 10 }
  0x19   : > { %s3078_s17 = scalar_select %p2104_p11, 1, 0 }
  0x1a   : > { %s3024_s19 = sshll.u32 %s2111_s18, 6  ;;  %s3079_s0 = sld [smem:[#allocation34_spill]] }
  0x1b   : > { %s261_s24 = scalar_lea.vmem [#allocation3], %s3024_s19  ;;  %p2128_p0 = pnand %p1657_p13, %p2087_p4 }
  0x1c   : > { %s268_s25 = sshll.u32 %s261_s24, 4  ;;  %s258_s9 = scalar_lea.sflag [#allocation4], %s2111_s18  ;;  %s2124_s25 = int_to_ptr.vmem [resolvable:$true] %s268_s25 }
  0x1d   : > { %p1848_p3 = pneg %p2128_p0 }
  0x20   : > { %s2120_s23 = scalar_lea.hbm %s3079_s0, %s1621_s20  ;;  %s1851_s12 = scalar_lea.hbm %s3079_s0, 2048 }
  0x21   : > { %s1846_s11 = scalar_lea.hbm %s2120_s23, 1024  ;;  %p1852_p4 = scmp.lt.u32.totalorder %s2120_s23, %s3079_s0 }
  0x22   : > { %p1847_p2 = scmp.ne.s32.totalorder %s2120_s23, %s1846_s11  ;;  %p1853_p7 = scmp.lt.u32.totalorder %s1851_s12, %s1846_s11 }
  0x23   : > { %p1855_p13 = scmp.lt.u32.totalorder %s1846_s11, %s2120_s23 }
  0x24   : > { %p1849_p5 = pnand %p1848_p3, %p1847_p2  ;;  %p1854_p10 = por %p1853_p7, %p1852_p4 }
  0x26   : > { %p1850_p6 = pneg %p1849_p5  ;;  %p1856_p12 = por %p1855_p13, %p1854_p10 }
  0x28   : > { %p1857_p1 = pnand %p1856_p12, %p1850_p6 }
  0x2a   : > { %1860 = shalt.err (!%p1857_p1)
}
  0x2b   : > { %s1861_s19 = scalar_lea.vmem %s2124_s25, 1024  ;;  %s1994_s13 = smov [#allocation3]  }
  0x2c   : > { %p1862_p2 = scmp.ne.s32.totalorder %s2124_s25, %s1861_s19  ;;  %s1866_s21 = sshll.u32 %s1994_s13, 4  ;;  %s1867_s21 = int_to_ptr.vmem [resolvable:$false] %s1866_s21 }
  0x2d   : > { %s1868_s22 = scalar_lea.vmem %s1867_s21, 2048  ;;  %p1869_p9 = scmp.lt.s32.totalorder %s2124_s25, %s1867_s21 }
  0x2e   : > { %p1864_p5 = pnand %p1862_p2, %p1848_p3  ;;  %p1870_p4 = scmp.lt.s32.totalorder %s1868_s22, %s1861_s19 }
  0x30   : > { %p1865_p11 = pneg %p1864_p5  ;;  %p1871_p7 = por %p1870_p4, %p1869_p9 }
  0x32   : > { %p1872_p10 = pnand %p1871_p7, %p1865_p11 }
  0x34   : > { %1875 = shalt.err (!%p1872_p10)
}
  0x35   : > { %s3027_s11 = smov 256   ;;  %s1996_s12 = smov 16  }
  0x36   : > { %1649 = dma.hbm_to_vmem [thread:$0]  (!%p2128_p0), %s2120_s23, 1024, %s2124_s25, %s258_s9, %s3027_s11, %s3027_s11, %s1996_s12  }
  0x37   : > { %p297_p9 = scmp.lt.s32.totalorder %s1992_s8, 3  ;;  %s2170_s13 = scalar_lea.hbm %s3017_s1, %s1621_s20 }
  0x38   : > { %p3081_p11 = scmp.ge.s32.totalorder %s1992_s8, 1  ;;  %s3083_s22 = sshll.u32 %s2111_s18, 6 }
  0x39   : > { %s282_s0 = scalar_lea.vmem [#allocation6], %s3083_s22  ;;  %s279_s23 = scalar_lea.sflag [#allocation7], %s2111_s18 }
  0x3a   : > { %p2174_p12 = pnand %p3081_p11, %p297_p9  ;;  %s289_s10 = sshll.u32 %s282_s0, 4  ;;  %s2180_s10 = int_to_ptr.vmem [resolvable:$true] %s289_s10 }
  0x3b   : > { %s1876_s25 = scalar_lea.hbm %s2170_s13, 1024  ;;  %s1881_s19 = scalar_lea.hbm %s3017_s1, 2048 }
  0x3c   : > { %p1877_p1 = scmp.ne.s32.totalorder %s2170_s13, %s1876_s25  ;;  %p1882_p2 = scmp.lt.u32.totalorder %s2170_s13, %s3017_s1 }
  0x3d   : > { %p1883_p5 = scmp.lt.u32.totalorder %s1881_s19, %s1876_s25  ;;  %p1885_p7 = scmp.lt.u32.totalorder %s1876_s25, %s2170_s13 }
  0x3e   : > { %p1879_p6 = pnand %p1877_p1, %p1848_p3 }
  0x3f   : > { %p1884_p4 = por %p1883_p5, %p1882_p2 }
  0x40   : > { %p1880_p13 = pneg %p1879_p6 }
  0x41   : > { %p1886_p10 = por %p1885_p7, %p1884_p4 }
  0x43   : > { %p1887_p9 = pnand %p1886_p10, %p1880_p13 }
  0x45   : > { %1890 = shalt.err (!%p1887_p9)
}
  0x46   : > { %s1891_s0 = scalar_lea.vmem %s2180_s10, 1024  ;;  %s1997_s22 = smov [#allocation6]  }
  0x47   : > { %p1892_p11 = scmp.ne.s32.totalorder %s2180_s10, %s1891_s0  ;;  %s1896_s20 = sshll.u32 %s1997_s22, 4  ;;  %s1897_s20 = int_to_ptr.vmem [resolvable:$false] %s1896_s20 }
  0x48   : > { %s1898_s11 = scalar_lea.vmem %s1897_s20, 2048  ;;  %p1899_p8 = scmp.lt.s32.totalorder %s2180_s10, %s1897_s20 }
  0x49   : > { %p1894_p1 = pnand %p1892_p11, %p1848_p3  ;;  %p1900_p2 = scmp.lt.s32.totalorder %s1898_s11, %s1891_s0 }
  0x4b   : > { %p1895_p6 = pneg %p1894_p1  ;;  %p1901_p5 = por %p1900_p2, %p1899_p8 }
  0x4d   : > { %p1902_p4 = pnand %p1901_p5, %p1895_p6 }
  0x4f   : > { %1905 = shalt.err (!%p1902_p4)
}
  0x50   : > { %s3084_s25 = smov 256   ;;  %301 = sbr.rel (%p2174_p12) target bundleno = 1162 (0x48a), region = 48 }
  0x51   : > { %1652 = dma.hbm_to_vmem [thread:$0]  (!%p2128_p0), %s2170_s13, 1024, %s2180_s10, %s279_s23, %s3084_s25, %s3084_s25, %s1996_s12  }
  0x57   : > { %s2214_s9 = sand.u32 1, %s1976_s27   ;;  %p3085_p8 = scmp.ne.s32.totalorder %s3076_s14, 0 }
  0x58   : > { %s2217_s19 = sshll.u32 %s2214_s9, 6  ;;  %s304_s6 = scalar_lea.sflag [#allocation4], %s2214_s9 }
  0x59   : > { %s307_s24 = scalar_lea.vmem [#allocation3], %s2217_s19 }
  0x5a   : > { %1959 = dma.done.wait (%p3085_p8), %s304_s6, 1024  }
  0x5b   : > { %1961 = vsyncadd (%p3085_p8), %s304_s6, 4294966272  ;;  %s313_s10 = scalar_lea.sflag [#allocation7], %s2214_s9  ;;  %s2227_s18 = scalar_lea.vmem [#allocation6], %s2217_s19 }
  0x5c   : > { %1963 = dma.done.wait (%p3085_p8), %s313_s10, 1024  }
  0x5d   : > { %1965 = vsyncadd (%p3085_p8), %s313_s10, 4294966272  ;;  %v1998_v0 = vmov 0.0   ;;  %v1999_v1 = vmov 0   ;;  %v355_v2 = vld [vmem:[%s307_s24 + $0x8] sm:$0xff]  ;;  %v357_v3 = vld [vmem:[%s307_s24 + $0x18] sm:$0xff]  ;;  %vm377_vm0 = vcmask 261120  }
  0x5e   : > { %445 = vmatprep.mubr.f32.mxu1 %v1998_v0  ;;  %1713 = vset.pattern.permute.xlu0 %v1999_v1  ;;  %v354_v4 = vld [vmem:[%s307_s24] sm:$0xff]  ;;  %v1624_v5 = vpack.c.bf16 %v357_v3, %v355_v2  ;;  %v356_v6 = vld [vmem:[%s307_s24 + $0x10] sm:$0xff]  ;;  %v359_v7 = vld [vmem:[%s307_s24 + $0x28] sm:$0xff]  ;;  %vm706_vm1 = vcmask 1043456   ;;  %vm609_vm2 = vcmask 31744   ;;  %s1399_s11 = sld [smem:[#allocation2]] }
  0x5f   : > { %777 = vmatprep.mubr.f32.mxu0 %v1998_v0  ;;  %v361_v8 = vld [vmem:[%s307_s24 + $0x38] sm:$0xff]  ;;  %v1626_v9 = vpack.c.bf16 %v356_v6, %v354_v4  ;;  %v358_v11 = vld [vmem:[%s307_s24 + $0x20] sm:$0xff]  ;;  %v360_v12 = vld [vmem:[%s307_s24 + $0x30] sm:$0xff]  ;;  %s351_s25 = scalar_lea.vmem [#allocation8], %s2217_s19  ;;  %s1623_s24 = sshll.u32 %s1984_s29, 10 }
  0x60   : > { %v1628_v10 = vpack.c.bf16 %v361_v8, %v359_v7  ;;  %1625 = vmatprep.subr.bf16.mxu1 %v1624_v5  ;;  %v371_v13 = vld [vmem:[%s3021_s5] sm:$0xf]  ;;  %v1630_v14 = vpack.c.bf16 %v360_v12, %v358_v11  ;;  %s1455_s6 = sshll.u32 %s351_s25, 4  ;;  %s1440_s29 = scalar_lea.sflag [#allocation5], %s2214_s9  ;;  %s2961_s6 = int_to_ptr.vmem [resolvable:$true] %s1455_s6 }
  0x61   : > { %1627 = vmatpush1.bf16.msra.mxu1 %v1626_v9  ;;  %374 = vperm.xlu0 %1713, %v371_v13   ;;  %v465_v15 = vld [vmem:[%s3019_s3] sm:$0xf]  ;;  %s1906_s14 = scalar_lea.vmem %s2961_s6, 1024  ;;  %p3192_p3 = scmp.ne.s32.totalorder %s3077_s15, 0 }
  0x62   : > { %1629 = vmatprep.subr.bf16.mxu1 %v1628_v10  ;;  %v370_v16 = vld [vmem:[%s3020_s4] sm:$0xf]  ;;  %p1907_p0 = scmp.ne.s32.totalorder %s2961_s6, %s1906_s14  ;;  %s2000_s12 = smov [#allocation8]  }
  0x63   : > { %v464_v17 = vld [vmem:[%s3018_s2] sm:$0xf]  ;;  %s1910_s13 = sshll.u32 %s2000_s12, 4  ;;  %s1911_s13 = int_to_ptr.vmem [resolvable:$false] %s1910_s13 }
  0x64   : > { %p1908_p12 = pnand %p1907_p0, %p3192_p3  ;;  %s1912_s21 = scalar_lea.vmem %s1911_s13, 2048 }
  0x65   : > { %1631 = vmatpush1.bf16.msra.mxu1 %v1630_v14  ;;  %468 = vperm.xlu0 %1713, %v465_v15   ;;  %p1913_p7 = scmp.lt.s32.totalorder %s2961_s6, %s1911_s13  ;;  %p1914_p10 = scmp.lt.s32.totalorder %s1912_s21, %s1906_s14 }
  0x66   : > { %1633 = vmatprep.subr.bf16.mxu1 %v1624_v5  ;;  %p1909_p13 = pneg %p1908_p12 }
  0x67   : > { %p1915_p9 = por %p1914_p10, %p1913_p7 }
  0x68   : > { %1580 = vmatmul.mubr.msk.f32.vlgmr.msra.gmra.mrb[0].mxu1 %vm377_vm0, %v370_v16 }
  0x69   : > { %1635 = vmatpush1.bf16.msra.mxu1 %v1626_v9  ;;  %538 = vmatprep.mubr.f32.mxu1 %v1998_v0  ;;  %p1916_p11 = pnand %p1915_p9, %p1909_p13 }
  0x6a   : > { %1637 = vmatprep.subr.bf16.mxu1 %v1628_v10 }
  0x6d   : > { %1639 = vmatpush1.bf16.msra.mxu1 %v1630_v14 }
  0x70   : > { %1581 = vmatmul.mubr.msk.f32.vlgmr.msra.gmra.mrb[2].mxu1 %vm377_vm0, %v464_v17 }
  0xe0   : > { %v375_v18 = vpop.permute.xlu0 %374 }
  0xe4   : > { %v469_v23 = vpop.permute.xlu0 %468 }
 0x13b   : > { %v447_v19 = vpop.f32.mrb[0].mxu1 }
 0x13c   : > { %v449_v20 = vpop.f32.mrb[1].mxu1  ;;  %v448_v21 = vadd.f32 %v447_v19, %v375_v18 }
 0x13d   : > { %v450_v27 = vadd.f32 %v449_v20, %v375_v18 }
 0x13e   : > { %545 = vxpose.xlu1.b32.start.end [1/1] (short) %v448_v21, 128 }
 0x143   : > { %v540_v22 = vpop.f32.mrb[2].mxu1 }
 0x144   : > { %v542_v24 = vpop.f32.mrb[3].mxu1  ;;  %v541_v26 = vadd.f32 %v540_v22, %v469_v23 }
 0x145   : > { %v543_v25 = vadd.f32 %v542_v24, %v469_v23 }
 0x147   : > { %1582 = vmatprep.subr.msk.mxu0 %vm706_vm1, %v543_v25 }
 0x148   : > { %1583 = vmatpush1.msk.msra.mxu0 %vm706_vm1, %v541_v26 }
 0x17b   : > { %577 = vxpose.xlu1.b32.start.end [1/1] (short) %v450_v27, 128 }
 0x1be   : > { %v561_v28 = vpop.trf.xlu1 }
 0x1bf   : > { %1584 = vmatmul.mubr.msk.f32.vlgmr.msra.gmra.mrb[0].mxu0 %vm609_vm2, %v561_v28 }
 0x1c0   : > { %783 = vmatprep.mubr.f32.mxu0 %v1998_v0 }
 0x1c2   : > { %v562_v29 = vpop.trf.xlu1 }
 0x1c3   : > { %1585 = vmatmul.mubr.msk.f32.gmra.mrb[2].mxu0 %vm609_vm2, %v562_v29 }
 0x1c4   : > { %789 = vmatprep.mubr.f32.mxu0 %v1998_v0 }
 0x1c6   : > { %v563_v30 = vpop.trf.xlu1 }
 0x1c7   : > { %1586 = vmatmul.mubr.msk.f32.gmra.mrb[4].mxu0 %vm609_vm2, %v563_v30 }
 0x1c8   : > { %795 = vmatprep.mubr.f32.mxu0 %v1998_v0 }
 0x1ca   : > { %v564_v31 = vpop.trf.xlu1 }
 0x1cb   : > { %1587 = vmatmul.mubr.msk.f32.gmra.mrb[6].mxu0 %vm609_vm2, %v564_v31 }
 0x1cc   : > { %801 = vmatprep.mubr.f32.mxu0 %v1998_v0 }
 0x1ce   : > { %v565_v32 = vpop.trf.xlu1 }
 0x1cf   : > { %1588 = vmatmul.mubr.msk.f32.gmra.mrb[8].mxu0 %vm609_vm2, %v565_v32 }
 0x1d0   : > { %807 = vmatprep.mubr.f32.mxu0 %v1998_v0 }
 0x1d2   : > { %v566_v33 = vpop.trf.xlu1 }
 0x1d3   : > { %1589 = vmatmul.mubr.msk.f32.gmra.mrb[10].mxu0 %vm609_vm2, %v566_v33 }
 0x1d4   : > { %813 = vmatprep.mubr.f32.mxu0 %v1998_v0 }
 0x1d6   : > { %v567_v34 = vpop.trf.xlu1 }
 0x1d7   : > { %1590 = vmatmul.mubr.msk.f32.gmra.mrb[12].mxu0 %vm609_vm2, %v567_v34 }
 0x1d8   : > { %819 = vmatprep.mubr.f32.mxu0 %v1998_v0 }
 0x1da   : > { %v568_v35 = vpop.trf.xlu1 }
 0x1db   : > { %1591 = vmatmul.mubr.msk.f32.gmra.mrb[14].mxu0 %vm609_vm2, %v568_v35 }
 0x1dc   : > { %825 = vmatprep.mubr.f32.mxu0 %v1998_v0 }
 0x1de   : > { %v569_v36 = vpop.trf.xlu1 }
 0x1df   : > { %1592 = vmatmul.mubr.msk.f32.gmra.mrb[16].mxu0 %vm609_vm2, %v569_v36 }
 0x1e0   : > { %831 = vmatprep.mubr.f32.mxu0 %v1998_v0 }
 0x1e2   : > { %v570_v37 = vpop.trf.xlu1 }
 0x1e3   : > { %1593 = vmatmul.mubr.msk.f32.gmra.mrb[18].mxu0 %vm609_vm2, %v570_v37 }
 0x1e4   : > { %837 = vmatprep.mubr.f32.mxu0 %v1998_v0 }
 0x1e6   : > { %v571_v38 = vpop.trf.xlu1 }
 0x1e7   : > { %1594 = vmatmul.mubr.msk.f32.gmra.mrb[20].mxu0 %vm609_vm2, %v571_v38 }
 0x1e8   : > { %843 = vmatprep.mubr.f32.mxu0 %v1998_v0 }
 0x1ea   : > { %v572_v39 = vpop.trf.xlu1 }
 0x1eb   : > { %1595 = vmatmul.mubr.msk.f32.gmra.mrb[22].mxu0 %vm609_vm2, %v572_v39 }
 0x1ec   : > { %849 = vmatprep.mubr.f32.mxu0 %v1998_v0 }
 0x1ee   : > { %v573_v40 = vpop.trf.xlu1 }
 0x1ef   : > { %1596 = vmatmul.mubr.msk.f32.gmra.mrb[24].mxu0 %vm609_vm2, %v573_v40 }
 0x1f0   : > { %855 = vmatprep.mubr.f32.mxu0 %v1998_v0 }
 0x1f2   : > { %v574_v41 = vpop.trf.xlu1 }
 0x1f3   : > { %1597 = vmatmul.mubr.msk.f32.gmra.mrb[26].mxu0 %vm609_vm2, %v574_v41 }
 0x1f4   : > { %861 = vmatprep.mubr.f32.mxu0 %v1998_v0 }
 0x1f6   : > { %v575_v42 = vpop.trf.xlu1 }
 0x1f7   : > { %1598 = vmatmul.mubr.msk.f32.gmra.mrb[28].mxu0 %vm609_vm2, %v575_v42 }
 0x1f8   : > { %867 = vmatprep.mubr.f32.mxu0 %v1998_v0 }
 0x1fa   : > { %v576_v43 = vpop.trf.xlu1 }
 0x1fb   : > { %1599 = vmatmul.mubr.msk.f32.gmra.mrb[30].mxu0 %vm609_vm2, %v576_v43 }
 0x1fc   : > { %873 = vmatprep.mubr.f32.mxu0 %v1998_v0 }
 0x1fe   : > { %v593_v44 = vpop.trf.xlu1 }
 0x1ff   : > { %1600 = vmatmul.mubr.msk.f32.gmra.mrb[32].mxu0 %vm609_vm2, %v593_v44 }
 0x200   : > { %879 = vmatprep.mubr.f32.mxu0 %v1998_v0 }
 0x202   : > { %v594_v45 = vpop.trf.xlu1 }
 0x203   : > { %1601 = vmatmul.mubr.msk.f32.gmra.mrb[34].mxu0 %vm609_vm2, %v594_v45 }
 0x204   : > { %885 = vmatprep.mubr.f32.mxu0 %v1998_v0 }
 0x206   : > { %v595_v46 = vpop.trf.xlu1 }
 0x207   : > { %1602 = vmatmul.mubr.msk.f32.gmra.mrb[36].mxu0 %vm609_vm2, %v595_v46 }
 0x208   : > { %891 = vmatprep.mubr.f32.mxu0 %v1998_v0 }
 0x20a   : > { %v596_v47 = vpop.trf.xlu1 }
 0x20b   : > { %1603 = vmatmul.mubr.msk.f32.gmra.mrb[38].mxu0 %vm609_vm2, %v596_v47 }
 0x20c   : > { %897 = vmatprep.mubr.f32.mxu0 %v1998_v0 }
 0x20e   : > { %v597_v48 = vpop.trf.xlu1 }
 0x20f   : > { %1604 = vmatmul.mubr.msk.f32.gmra.mrb[40].mxu0 %vm609_vm2, %v597_v48 }
 0x210   : > { %903 = vmatprep.mubr.f32.mxu0 %v1998_v0 }
 0x212   : > { %v598_v49 = vpop.trf.xlu1 }
 0x213   : > { %1605 = vmatmul.mubr.msk.f32.gmra.mrb[42].mxu0 %vm609_vm2, %v598_v49 }
 0x214   : > { %909 = vmatprep.mubr.f32.mxu0 %v1998_v0 }
 0x216   : > { %v599_v50 = vpop.trf.xlu1 }
 0x217   : > { %1606 = vmatmul.mubr.msk.f32.gmra.mrb[44].mxu0 %vm609_vm2, %v599_v50 }
 0x218   : > { %915 = vmatprep.mubr.f32.mxu0 %v1998_v0 }
 0x21a   : > { %v600_v51 = vpop.trf.xlu1 }
 0x21b   : > { %1607 = vmatmul.mubr.msk.f32.gmra.mrb[46].mxu0 %vm609_vm2, %v600_v51 }
 0x21c   : > { %921 = vmatprep.mubr.f32.mxu0 %v1998_v0 }
 0x21e   : > { %v601_v52 = vpop.trf.xlu1 }
 0x21f   : > { %1608 = vmatmul.mubr.msk.f32.gmra.mrb[48].mxu0 %vm609_vm2, %v601_v52 }
 0x220   : > { %927 = vmatprep.mubr.f32.mxu0 %v1998_v0 }
 0x222   : > { %v602_v53 = vpop.trf.xlu1 }
 0x223   : > { %1609 = vmatmul.mubr.msk.f32.gmra.mrb[50].mxu0 %vm609_vm2, %v602_v53 }
 0x224   : > { %933 = vmatprep.mubr.f32.mxu0 %v1998_v0 }
 0x226   : > { %v603_v54 = vpop.trf.xlu1 }
 0x227   : > { %1610 = vmatmul.mubr.msk.f32.gmra.mrb[52].mxu0 %vm609_vm2, %v603_v54 }
 0x228   : > { %939 = vmatprep.mubr.f32.mxu0 %v1998_v0 }
 0x22a   : > { %v604_v55 = vpop.trf.xlu1 }
 0x22b   : > { %1611 = vmatmul.mubr.msk.f32.gmra.mrb[54].mxu0 %vm609_vm2, %v604_v55 }
 0x22c   : > { %945 = vmatprep.mubr.f32.mxu0 %v1998_v0 }
 0x22e   : > { %v605_v56 = vpop.trf.xlu1 }
 0x22f   : > { %1612 = vmatmul.mubr.msk.f32.gmra.mrb[56].mxu0 %vm609_vm2, %v605_v56 }
 0x230   : > { %951 = vmatprep.mubr.f32.mxu0 %v1998_v0 }
 0x232   : > { %v606_v57 = vpop.trf.xlu1 }
 0x233   : > { %1613 = vmatmul.mubr.msk.f32.gmra.mrb[58].mxu0 %vm609_vm2, %v606_v57 }
 0x234   : > { %957 = vmatprep.mubr.f32.mxu0 %v1998_v0 }
 0x236   : > { %v607_v58 = vpop.trf.xlu1 }
 0x237   : > { %1614 = vmatmul.mubr.msk.f32.gmra.mrb[60].mxu0 %vm609_vm2, %v607_v58 }
 0x238   : > { %963 = vmatprep.mubr.f32.mxu0 %v1998_v0 }
 0x23a   : > { %v608_v59 = vpop.trf.xlu1 }
 0x23b   : > { %1615 = vmatmul.mubr.msk.f32.gmra.mrb[62].mxu0 %vm609_vm2, %v608_v59 }
 0x292   : > { %v2311_v60 = vpop.f32.mrb[0].mxu0 }
 0x293   : > { %v2313_v61 = vpop.f32.mrb[1].mxu0 }
 0x296   : > { %v2315_v62 = vpop.f32.mrb[2].mxu0 }
 0x297   : > { %v2317_v63 = vpop.f32.mrb[3].mxu0 }
 0x29a   : > { %v2319_v1 = vpop.f32.mrb[4].mxu0 }
 0x29b   : > { %v970_v2 = vmax.f32 %v2311_v60, %v2319_v1  ;;  %v2323_v3 = vpop.f32.mrb[5].mxu0 }
 0x29c   : > { %v1007_v0 = vmax.f32 %v2313_v61, %v2323_v3 }
 0x29e   : > { %v2327_v4 = vpop.f32.mrb[6].mxu0 }
 0x29f   : > { %v971_v5 = vmax.f32 %v2315_v62, %v2327_v4  ;;  %v2331_v6 = vpop.f32.mrb[7].mxu0 }
 0x2a0   : > { %v1008_v7 = vmax.f32 %v2317_v63, %v2331_v6 }
 0x2a2   : > { %v2335_v8 = vpop.f32.mrb[8].mxu0 }
 0x2a3   : > { %v972_v9 = vmax.f32 %v970_v2, %v2335_v8  ;;  %v2338_v10 = vpop.f32.mrb[9].mxu0 }
 0x2a4   : > { %v1009_v11 = vmax.f32 %v1007_v0, %v2338_v10 }
 0x2a6   : > { %v2341_v12 = vpop.f32.mrb[10].mxu0 }
 0x2a7   : > { %v973_v13 = vmax.f32 %v971_v5, %v2341_v12  ;;  %v2344_v14 = vpop.f32.mrb[11].mxu0 }
 0x2a8   : > { %v1010_v15 = vmax.f32 %v1008_v7, %v2344_v14 }
 0x2aa   : > { %v2347_v16 = vpop.f32.mrb[12].mxu0 }
 0x2ab   : > { %v974_v17 = vmax.f32 %v972_v9, %v2347_v16  ;;  %v2350_v18 = vpop.f32.mrb[13].mxu0 }
 0x2ac   : > { %v1011_v19 = vmax.f32 %v1009_v11, %v2350_v18 }
 0x2ae   : > { %v2353_v20 = vpop.f32.mrb[14].mxu0 }
 0x2af   : > { %v975_v21 = vmax.f32 %v973_v13, %v2353_v20  ;;  %v2356_v22 = vpop.f32.mrb[15].mxu0 }
 0x2b0   : > { %v1012_v23 = vmax.f32 %v1010_v15, %v2356_v22 }
 0x2b2   : > { %v2359_v24 = vpop.f32.mrb[16].mxu0 }
 0x2b3   : > { %v976_v25 = vmax.f32 %v974_v17, %v2359_v24  ;;  %v2362_v26 = vpop.f32.mrb[17].mxu0 }
 0x2b4   : > { %v1013_v27 = vmax.f32 %v1011_v19, %v2362_v26 }
 0x2b6   : > { %v2365_v28 = vpop.f32.mrb[18].mxu0 }
 0x2b7   : > { %v977_v29 = vmax.f32 %v975_v21, %v2365_v28  ;;  %v2368_v30 = vpop.f32.mrb[19].mxu0 }
 0x2b8   : > { %v1014_v31 = vmax.f32 %v1012_v23, %v2368_v30 }
 0x2ba   : > { %v2371_v32 = vpop.f32.mrb[20].mxu0 }
 0x2bb   : > { %v978_v33 = vmax.f32 %v976_v25, %v2371_v32  ;;  %v2374_v34 = vpop.f32.mrb[21].mxu0 }
 0x2bc   : > { %v1015_v35 = vmax.f32 %v1013_v27, %v2374_v34 }
 0x2be   : > { %v2377_v36 = vpop.f32.mrb[22].mxu0 }
 0x2bf   : > { %v979_v37 = vmax.f32 %v977_v29, %v2377_v36  ;;  %v2380_v38 = vpop.f32.mrb[23].mxu0 }
 0x2c0   : > { %3086 = vst [vmem:[#allocation13_spill] sm:$0xff] %v2380_v38  ;;  %v1016_v39 = vmax.f32 %v1014_v31, %v2380_v38 }
 0x2c2   : > { %v2383_v40 = vpop.f32.mrb[24].mxu0 }
 0x2c3   : > { %v980_v41 = vmax.f32 %v978_v33, %v2383_v40  ;;  %v2386_v42 = vpop.f32.mrb[25].mxu0 }
 0x2c4   : > { %3087 = vst [vmem:[#allocation14_spill] sm:$0xff] %v2386_v42  ;;  %v1017_v43 = vmax.f32 %v1015_v35, %v2386_v42 }
 0x2c6   : > { %v2389_v44 = vpop.f32.mrb[26].mxu0 }
 0x2c7   : > { %v981_v45 = vmax.f32 %v979_v37, %v2389_v44  ;;  %v2392_v46 = vpop.f32.mrb[27].mxu0 }
 0x2c8   : > { %3088 = vst [vmem:[#allocation15_spill] sm:$0xff] %v2392_v46  ;;  %v1018_v47 = vmax.f32 %v1016_v39, %v2392_v46 }
 0x2ca   : > { %v2395_v48 = vpop.f32.mrb[28].mxu0 }
 0x2cb   : > { %v982_v49 = vmax.f32 %v980_v41, %v2395_v48  ;;  %v2398_v50 = vpop.f32.mrb[29].mxu0 }
 0x2cc   : > { %3089 = vst [vmem:[#allocation16_spill] sm:$0xff] %v2398_v50  ;;  %v1019_v51 = vmax.f32 %v1017_v43, %v2398_v50 }
 0x2ce   : > { %v2401_v52 = vpop.f32.mrb[30].mxu0 }
 0x2cf   : > { %v983_v53 = vmax.f32 %v981_v45, %v2401_v52  ;;  %v2404_v54 = vpop.f32.mrb[31].mxu0 }
 0x2d0   : > { %3090 = vst [vmem:[#allocation17_spill] sm:$0xff] %v2404_v54  ;;  %v1020_v55 = vmax.f32 %v1018_v47, %v2404_v54 }
 0x2d2   : > { %v2407_v56 = vpop.f32.mrb[32].mxu0 }
 0x2d3   : > { %v984_v57 = vmax.f32 %v982_v49, %v2407_v56  ;;  %v2410_v58 = vpop.f32.mrb[33].mxu0 }
 0x2d4   : > { %3091 = vst [vmem:[#allocation18_spill] sm:$0xff] %v2410_v58  ;;  %v1021_v59 = vmax.f32 %v1019_v51, %v2410_v58 }
 0x2d6   : > { %v2413_v2 = vpop.f32.mrb[34].mxu0 }
 0x2d7   : > { %v985_v0 = vmax.f32 %v983_v53, %v2413_v2  ;;  %v2416_v5 = vpop.f32.mrb[35].mxu0 }
 0x2d8   : > { %3092 = vst [vmem:[#allocation19_spill] sm:$0xff] %v2416_v5  ;;  %v1022_v7 = vmax.f32 %v1020_v55, %v2416_v5 }
 0x2da   : > { %v2419_v9 = vpop.f32.mrb[36].mxu0 }
 0x2db   : > { %v986_v11 = vmax.f32 %v984_v57, %v2419_v9  ;;  %v2422_v13 = vpop.f32.mrb[37].mxu0 }
 0x2dc   : > { %3093 = vst [vmem:[#allocation20_spill] sm:$0xff] %v2422_v13  ;;  %v1023_v15 = vmax.f32 %v1021_v59, %v2422_v13 }
 0x2de   : > { %v2425_v17 = vpop.f32.mrb[38].mxu0 }
 0x2df   : > { %v987_v19 = vmax.f32 %v985_v0, %v2425_v17  ;;  %v2428_v21 = vpop.f32.mrb[39].mxu0 }
 0x2e0   : > { %3094 = vst [vmem:[#allocation21_spill] sm:$0xff] %v2428_v21  ;;  %v1024_v23 = vmax.f32 %v1022_v7, %v2428_v21 }
 0x2e2   : > { %v2431_v25 = vpop.f32.mrb[40].mxu0 }
 0x2e3   : > { %v988_v27 = vmax.f32 %v986_v11, %v2431_v25  ;;  %v2434_v29 = vpop.f32.mrb[41].mxu0 }
 0x2e4   : > { %3095 = vst [vmem:[#allocation22_spill] sm:$0xff] %v2434_v29  ;;  %v1025_v31 = vmax.f32 %v1023_v15, %v2434_v29 }
 0x2e6   : > { %v2437_v33 = vpop.f32.mrb[42].mxu0 }
 0x2e7   : > { %v989_v35 = vmax.f32 %v987_v19, %v2437_v33  ;;  %v2440_v37 = vpop.f32.mrb[43].mxu0 }
 0x2e8   : > { %3096 = vst [vmem:[#allocation23_spill] sm:$0xff] %v2440_v37  ;;  %v1026_v39 = vmax.f32 %v1024_v23, %v2440_v37 }
 0x2ea   : > { %v2443_v41 = vpop.f32.mrb[44].mxu0 }
 0x2eb   : > { %v990_v43 = vmax.f32 %v988_v27, %v2443_v41  ;;  %v2446_v45 = vpop.f32.mrb[45].mxu0 }
 0x2ec   : > { %3097 = vst [vmem:[#allocation24_spill] sm:$0xff] %v2446_v45  ;;  %v1027_v47 = vmax.f32 %v1025_v31, %v2446_v45 }
 0x2ee   : > { %v2449_v49 = vpop.f32.mrb[46].mxu0 }
 0x2ef   : > { %v991_v51 = vmax.f32 %v989_v35, %v2449_v49  ;;  %v2452_v53 = vpop.f32.mrb[47].mxu0 }
 0x2f0   : > { %3098 = vst [vmem:[#allocation25_spill] sm:$0xff] %v2452_v53  ;;  %v1028_v55 = vmax.f32 %v1026_v39, %v2452_v53 }
 0x2f2   : > { %v2455_v57 = vpop.f32.mrb[48].mxu0 }
 0x2f3   : > { %v992_v59 = vmax.f32 %v990_v43, %v2455_v57  ;;  %v2458_v0 = vpop.f32.mrb[49].mxu0 }
 0x2f4   : > { %3099 = vst [vmem:[#allocation26_spill] sm:$0xff] %v2458_v0  ;;  %v1029_v7 = vmax.f32 %v1027_v47, %v2458_v0 }
 0x2f6   : > { %v2461_v11 = vpop.f32.mrb[50].mxu0 }
 0x2f7   : > { %v993_v15 = vmax.f32 %v991_v51, %v2461_v11  ;;  %v2464_v19 = vpop.f32.mrb[51].mxu0 }
 0x2f8   : > { %3100 = vst [vmem:[#allocation27_spill] sm:$0xff] %v2464_v19  ;;  %v1030_v23 = vmax.f32 %v1028_v55, %v2464_v19 }
 0x2fa   : > { %v2467_v27 = vpop.f32.mrb[52].mxu0 }
 0x2fb   : > { %v994_v31 = vmax.f32 %v992_v59, %v2467_v27  ;;  %v2470_v35 = vpop.f32.mrb[53].mxu0 }
 0x2fc   : > { %3101 = vst [vmem:[#allocation28_spill] sm:$0xff] %v2470_v35  ;;  %v1031_v39 = vmax.f32 %v1029_v7, %v2470_v35 }
 0x2fe   : > { %v2473_v43 = vpop.f32.mrb[54].mxu0 }
 0x2ff   : > { %v995_v47 = vmax.f32 %v993_v15, %v2473_v43  ;;  %v2476_v0 = vpop.f32.mrb[55].mxu0 }
 0x300   : > { %3102 = vst [vmem:[#allocation29_spill] sm:$0xff] %v2476_v0  ;;  %v1032_v51 = vmax.f32 %v1030_v23, %v2476_v0 }
 0x302   : > { %v2479_v53 = vpop.f32.mrb[56].mxu0 }
 0x303   : > { %v996_v55 = vmax.f32 %v994_v31, %v2479_v53  ;;  %v2482_v19 = vpop.f32.mrb[57].mxu0 }
 0x304   : > { %3103 = vst [vmem:[#allocation30_spill] sm:$0xff] %v2482_v19  ;;  %v1033_v59 = vmax.f32 %v1031_v39, %v2482_v19 }
 0x306   : > { %v2485_v45 = vpop.f32.mrb[58].mxu0 }
 0x307   : > { %v997_v7 = vmax.f32 %v995_v47, %v2485_v45  ;;  %v2488_v35 = vpop.f32.mrb[59].mxu0 }
 0x308   : > { %3104 = vst [vmem:[#allocation31_spill] sm:$0xff] %v2488_v35  ;;  %v1034_v15 = vmax.f32 %v1032_v51, %v2488_v35 }
 0x30a   : > { %v2491_v37 = vpop.f32.mrb[60].mxu0 }
 0x30b   : > { %v998_v23 = vmax.f32 %v996_v55, %v2491_v37  ;;  %v2494_v0 = vpop.f32.mrb[61].mxu0 }
 0x30c   : > { %3105 = vst [vmem:[#allocation32_spill] sm:$0xff] %v2494_v0  ;;  %v1035_v31 = vmax.f32 %v1033_v59, %v2494_v0 }
 0x30e   : > { %v2497_v29 = vpop.f32.mrb[62].mxu0 }
 0x30f   : > { %v999_v39 = vmax.f32 %v997_v7, %v2497_v29  ;;  %v2500_v19 = vpop.f32.mrb[63].mxu0 }
 0x310   : > { %3106 = vst [vmem:[#allocation33_spill] sm:$0xff] %v2500_v19  ;;  %v1036_v47 = vmax.f32 %v1034_v15, %v2500_v19 }
 0x311   : > { %v1000_v21 = vmax.f32 %v998_v23, %v999_v39 }
 0x312   : > { %v1037_v13 = vmax.f32 %v1035_v31, %v1036_v47 }
 0x313   : > { %v1001_v5 = vrot.slane %v1000_v21, 4 }
 0x314   : > { %v1038_v51 = vrot.slane %v1037_v13, 4 }
 0x315   : > { %v1002_v35 = vmax.f32 %v1000_v21, %v1001_v5 }
 0x316   : > { %v1039_v58 = vmax.f32 %v1037_v13, %v1038_v51 }
 0x317   : > { %v1003_v54 = vrot.slane %v1002_v35, 2 }
 0x318   : > { %v1040_v55 = vrot.slane %v1039_v58, 2 }
 0x319   : > { %v1004_v50 = vmax.f32 %v1002_v35, %v1003_v54 }
 0x31a   : > { %v1041_v46 = vmax.f32 %v1039_v58, %v1040_v55 }
 0x31b   : > { %v1005_v42 = vrot.slane %v1004_v50, 1 }
 0x31c   : > { %v1042_v59 = vrot.slane %v1041_v46, 1 }
 0x31d   : > { %v2503_v0 = vmax.f32 %v1004_v50, %v1005_v42 }
 0x31e   : > { %v2505_v38 = vmax.f32 %v1041_v46, %v1042_v59 }
 0x31f   : > { %v1044_v7 = vsub.f32 %v2311_v60, %v2503_v0  ;;  %v1046_v15 = vsub.f32 %v2315_v62, %v2503_v0  ;;  %v1048_v5 = vsub.f32 %v2319_v1, %v2503_v0  ;;  %v1050_v13 = vsub.f32 %v2327_v4, %v2503_v0 }
 0x320   : > { %v1052_v54 = vsub.f32 %v2335_v8, %v2503_v0  ;;  %v1054_v42 = vsub.f32 %v2341_v12, %v2503_v0  ;;  %v1056_v46 = vsub.f32 %v2347_v16, %v2503_v0  ;;  %v1058_v60 = vsub.f32 %v2353_v20, %v2503_v0 }
 0x321   : > { %v1060_v62 = vsub.f32 %v2359_v24, %v2503_v0  ;;  %v1062_v1 = vsub.f32 %v2365_v28, %v2503_v0  ;;  %v1064_v4 = vsub.f32 %v2371_v32, %v2503_v0  ;;  %v1066_v8 = vsub.f32 %v2377_v36, %v2503_v0 }
 0x322   : > { %v1068_v12 = vsub.f32 %v2383_v40, %v2503_v0  ;;  %v1070_v16 = vsub.f32 %v2389_v44, %v2503_v0  ;;  %v1072_v20 = vsub.f32 %v2395_v48, %v2503_v0  ;;  %v1074_v24 = vsub.f32 %v2401_v52, %v2503_v0 }
 0x323   : > { %v1076_v28 = vsub.f32 %v2407_v56, %v2503_v0  ;;  %v1078_v32 = vsub.f32 %v2413_v2, %v2503_v0  ;;  %v1080_v36 = vsub.f32 %v2419_v9, %v2503_v0  ;;  %v1082_v40 = vsub.f32 %v2425_v17, %v2503_v0  ;;  %v3126_v56 = vld [vmem:[#allocation32_spill] sm:$0xff] }
 0x324   : > { %v1084_v44 = vsub.f32 %v2431_v25, %v2503_v0  ;;  %v1086_v48 = vsub.f32 %v2437_v33, %v2503_v0  ;;  %v1088_v50 = vsub.f32 %v2443_v41, %v2503_v0  ;;  %v1090_v52 = vsub.f32 %v2449_v49, %v2503_v0 }
 0x325   : > { %v1108_v41 = vmul.f32 1.442695, %v1044_v7  ;;  %v1112_v49 = vmul.f32 1.442695, %v1046_v15  ;;  %v1116_v35 = vmul.f32 1.442695, %v1048_v5 }
 0x326   : > { %v1120_v31 = vmul.f32 1.442695, %v1050_v13  ;;  %v1124_v47 = vmul.f32 1.442695, %v1052_v54  ;;  %v1128_v51 = vmul.f32 1.442695, %v1054_v42 }
 0x327   : > { %1714 = vpow2.f32 %v1108_v41  ;;  %v1132_v55 = vmul.f32 1.442695, %v1056_v46  ;;  %v1136_v59 = vmul.f32 1.442695, %v1058_v60  ;;  %v1140_v25 = vmul.f32 1.442695, %v1060_v62 }
 0x328   : > { %1716 = vpow2.f32 %v1112_v49  ;;  %v1144_v33 = vmul.f32 1.442695, %v1062_v1  ;;  %v1148_v7 = vmul.f32 1.442695, %v1064_v4  ;;  %v1152_v15 = vmul.f32 1.442695, %v1066_v8 }
 0x329   : > { %1718 = vpow2.f32 %v1116_v35  ;;  %v1156_v5 = vmul.f32 1.442695, %v1068_v12  ;;  %v1160_v23 = vmul.f32 1.442695, %v1070_v16  ;;  %v1164_v13 = vmul.f32 1.442695, %v1072_v20 }
 0x32a   : > { %1720 = vpow2.f32 %v1120_v31  ;;  %v1168_v21 = vmul.f32 1.442695, %v1074_v24  ;;  %v1172_v39 = vmul.f32 1.442695, %v1076_v28  ;;  %v1176_v41 = vmul.f32 1.442695, %v1078_v32 }
 0x32b   : > { %1722 = vpow2.f32 %v1124_v47  ;;  %v1180_v54 = vmul.f32 1.442695, %v1080_v36  ;;  %v1184_v42 = vmul.f32 1.442695, %v1082_v40  ;;  %v1188_v49 = vmul.f32 1.442695, %v1084_v44 }
 0x32c   : > { %1724 = vpow2.f32 %v1128_v51  ;;  %v2575_v46 = vmul.f32 1.442695, %v1086_v48  ;;  %v2577_v60 = vmul.f32 1.442695, %v1088_v50  ;;  %v2579_v62 = vmul.f32 1.442695, %v1090_v52 }
 0x32d   : > { %1726 = vpow2.f32 %v1132_v55  ;;  %v3107_v44 = vld [vmem:[#allocation13_spill] sm:$0xff]  ;;  %v3109_v35 = vld [vmem:[#allocation15_spill] sm:$0xff]  ;;  %v3110_v51 = vld [vmem:[#allocation16_spill] sm:$0xff] }
 0x32e   : > { %1728 = vpow2.f32 %v1136_v59  ;;  %v3111_v59 = vld [vmem:[#allocation17_spill] sm:$0xff]  ;;  %v3113_v40 = vld [vmem:[#allocation19_spill] sm:$0xff]  ;;  %v3114_v36 = vld [vmem:[#allocation20_spill] sm:$0xff] }
 0x32f   : > { %1730 = vpow2.f32 %v1140_v25  ;;  %v3108_v25 = vld [vmem:[#allocation14_spill] sm:$0xff]  ;;  %v3115_v55 = vld [vmem:[#allocation21_spill] sm:$0xff]  ;;  %v3117_v20 = vld [vmem:[#allocation23_spill] sm:$0xff] }
 0x330   : > { %1732 = vpow2.f32 %v1144_v33  ;;  %v3116_v24 = vld [vmem:[#allocation22_spill] sm:$0xff]  ;;  %v3118_v31 = vld [vmem:[#allocation24_spill] sm:$0xff]  ;;  %v3119_v8 = vld [vmem:[#allocation25_spill] sm:$0xff] }
 0x331   : > { %v2589_v16 = vpop.eup %1714  ;;  %1734 = vpow2.f32 %v1148_v7  ;;  %v3120_v7 = vld [vmem:[#allocation26_spill] sm:$0xff]  ;;  %v3121_v1 = vld [vmem:[#allocation27_spill] sm:$0xff] }
 0x332   : > { %v2597_v32 = vpop.eup %1716  ;;  %1736 = vpow2.f32 %v1152_v15  ;;  %v3112_v15 = vld [vmem:[#allocation18_spill] sm:$0xff] }
 0x333   : > { %v2605_v50 = vpop.eup %1718  ;;  %1738 = vpow2.f32 %v1156_v5  ;;  %v1236_v52 = vadd.f32 %v2597_v32, %v2589_v16  ;;  %v3125_v5 = vld [vmem:[#allocation31_spill] sm:$0xff] }
 0x334   : > { %v2613_v47 = vpop.eup %1720  ;;  %1740 = vpow2.f32 %v1160_v23  ;;  %v3123_v23 = vld [vmem:[#allocation29_spill] sm:$0xff] }
 0x335   : > { %v2621_v48 = vpop.eup %1722  ;;  %1742 = vpow2.f32 %v1164_v13  ;;  %v1237_v33 = vadd.f32 %v2605_v50, %v1236_v52 }
 0x336   : > { %v2628_v28 = vpop.eup %1724  ;;  %1744 = vpow2.f32 %v1168_v21 }
 0x337   : > { %v2636_v12 = vpop.eup %1726  ;;  %1746 = vpow2.f32 %v1172_v39  ;;  %v1238_v52 = vadd.f32 %v2613_v47, %v1237_v33 }
 0x338   : > { %v2643_v4 = vpop.eup %1728  ;;  %1748 = vpow2.f32 %v1176_v41 }
 0x339   : > { %v2651_v9 = vpop.eup %1730  ;;  %1750 = vpow2.f32 %v1180_v54  ;;  %v1239_v33 = vadd.f32 %v2621_v48, %v1238_v52  ;;  %v3127_v52 = vsub.f32 %v2455_v57, %v2503_v0 }
 0x33a   : > { %v2658_v58 = vpop.eup %1732  ;;  %1752 = vpow2.f32 %v1184_v42  ;;  %v3128_v42 = vsub.f32 %v2461_v11, %v2503_v0 }
 0x33b   : > { %v2666_v17 = vpop.eup %1734  ;;  %1754 = vpow2.f32 %v1188_v49  ;;  %v1204_v21 = vmul.f32 1.442695, %v3127_v52  ;;  %v1240_v41 = vadd.f32 %v2628_v28, %v1239_v33  ;;  %v3129_v49 = vsub.f32 %v2467_v27, %v2503_v0 }
 0x33c   : > { %v2672_v2 = vpop.eup %1736  ;;  %1756 = vpow2.f32 %v2575_v46  ;;  %v1208_v39 = vmul.f32 1.442695, %v3128_v42  ;;  %v3130_v46 = vsub.f32 %v2473_v43, %v2503_v0  ;;  %v3134_v43 = vsub.f32 %v2491_v37, %v2503_v0 }
 0x33d   : > { %v2678_v13 = vpop.eup %1738  ;;  %1758 = vpow2.f32 %v2577_v60  ;;  %v1212_v54 = vmul.f32 1.442695, %v3129_v49  ;;  %v1241_v57 = vadd.f32 %v2636_v12, %v1240_v41  ;;  %v3131_v60 = vsub.f32 %v2479_v53, %v2503_v0 }
 0x33e   : > { %v2685_v52 = vpop.eup %1740  ;;  %1760 = vpow2.f32 %v2579_v62  ;;  %v1216_v33 = vmul.f32 1.442695, %v3130_v46  ;;  %v3132_v41 = vsub.f32 %v2485_v45, %v2503_v0 }
 0x33f   : > { %v2691_v11 = vpop.eup %1742  ;;  %1762 = vpow2.f32 %v1204_v21  ;;  %v1220_v42 = vmul.f32 1.442695, %v3131_v60  ;;  %v1242_v27 = vadd.f32 %v2643_v4, %v1241_v57  ;;  %v1228_v21 = vmul.f32 1.442695, %v3134_v43 }
 0x340   : > { %v2697_v49 = vpop.eup %1744  ;;  %1764 = vpow2.f32 %v1208_v39  ;;  %v1224_v62 = vmul.f32 1.442695, %v3132_v41  ;;  %v3135_v57 = vsub.f32 %v2497_v29, %v2503_v0  ;;  %v3138_v29 = vsub.f32 %v2323_v3, %v2505_v38 }
 0x341   : > { %v2702_v19 = vpop.eup %1746  ;;  %1766 = vpow2.f32 %v1212_v54  ;;  %v1243_v46 = vadd.f32 %v2651_v9, %v1242_v27  ;;  %v3136_v54 = vsub.f32 %v2313_v61, %v2505_v38  ;;  %v3137_v27 = vsub.f32 %v2317_v63, %v2505_v38 }
 0x342   : > { %3133 = vst [vmem:[#allocation13_spill] sm:$0xff] %v2702_v19  ;;  %v2708_v53 = vpop.eup %1748  ;;  %1768 = vpow2.f32 %v1216_v33  ;;  %v1232_v39 = vmul.f32 1.442695, %v3135_v57  ;;  %v1118_v0 = vmul.f32 1.442695, %v3138_v29  ;;  %v3141_v63 = vsub.f32 %v2344_v14, %v2505_v38 }
 0x343   : > { %v2713_v60 = vpop.eup %1750  ;;  %1770 = vpow2.f32 %v1220_v42  ;;  %v1244_v45 = vadd.f32 %v2658_v58, %v1243_v46  ;;  %v1110_v41 = vmul.f32 1.442695, %v3136_v54  ;;  %v1114_v33 = vmul.f32 1.442695, %v3137_v27 }
 0x344   : > { %v2719_v37 = vpop.eup %1752  ;;  %1772 = vpow2.f32 %v1224_v62  ;;  %v3139_v42 = vsub.f32 %v2331_v6, %v2505_v38  ;;  %v3140_v62 = vsub.f32 %v2338_v10, %v2505_v38  ;;  %v1130_v54 = vmul.f32 1.442695, %v3141_v63 }
 0x345   : > { %v2730_v46 = vpop.eup %1754  ;;  %1774 = vpow2.f32 %v1228_v21  ;;  %v1245_v61 = vadd.f32 %v2666_v17, %v1244_v45  ;;  %v3142_v3 = vsub.f32 %v2350_v18, %v2505_v38  ;;  %v3143_v21 = vsub.f32 %v2356_v22, %v2505_v38 }
 0x346   : > { %v1122_v43 = vmul.f32 1.442695, %v3139_v42  ;;  %v1126_v57 = vmul.f32 1.442695, %v3140_v62  ;;  %v2739_v27 = vpop.eup %1756  ;;  %1776 = vpow2.f32 %v1232_v39  ;;  %v3144_v45 = vsub.f32 %v2362_v26, %v2505_v38 }
 0x347   : > { %v1134_v6 = vmul.f32 1.442695, %v3142_v3  ;;  %v1138_v29 = vmul.f32 1.442695, %v3143_v21  ;;  %v2750_v42 = vpop.eup %1758  ;;  %v1246_v14 = vadd.f32 %v2672_v2, %v1245_v61  ;;  %1778 = vpow2.f32 %v1110_v41 }
 0x348   : > { %v1142_v10 = vmul.f32 1.442695, %v3144_v45  ;;  %v3145_v39 = vsub.f32 %v2368_v30, %v2505_v38  ;;  %v3146_v18 = vsub.f32 %v2374_v34, %v2505_v38  ;;  %v2759_v22 = vpop.eup %1760  ;;  %1780 = vpow2.f32 %v1114_v33 }
 0x349   : > { %v2767_v30 = vpop.eup %1762  ;;  %v1247_v3 = vadd.f32 %v2678_v13, %v1246_v14  ;;  %1782 = vpow2.f32 %v1118_v0  ;;  %v2783_v14 = vld [vmem:[%s2227_s18 + $0x8] sm:$0xff]  ;;  %v2786_v0 = vld [vmem:[%s2227_s18 + $0x18] sm:$0xff] }
 0x34a   : > { %v1146_v62 = vmul.f32 1.442695, %v3145_v39  ;;  %v1150_v63 = vmul.f32 1.442695, %v3146_v18  ;;  %v2774_v21 = vpop.eup %1764  ;;  %1784 = vpow2.f32 %v1122_v43  ;;  %3147 = vst [vmem:[#allocation14_spill] sm:$0xff] %v2783_v14  ;;  %3148 = vst [vmem:[#allocation15_spill] sm:$0xff] %v2786_v0  ;;  %v3149_v39 = vsub.f32 %v3107_v44, %v2505_v38 }
 0x34b   : > { %v2788_v34 = vpop.eup %1766  ;;  %v1248_v33 = vadd.f32 %v2685_v52, %v1247_v3  ;;  %1786 = vpow2.f32 %v1126_v57  ;;  %v3151_v44 = vsub.f32 %v3109_v35, %v2505_v38  ;;  %v3154_v35 = vsub.f32 %v3112_v15, %v2505_v38 }
 0x34c   : > { %v2795_v41 = vpop.eup %1768  ;;  %1788 = vpow2.f32 %v1130_v54  ;;  %v1343_v54 = vpack.c.bf16 %v2786_v0, %v2783_v14  ;;  %v1154_v18 = vmul.f32 1.442695, %v3149_v39 }
 0x34d   : > { %v2803_v3 = vpop.eup %1770  ;;  %v1249_v57 = vadd.f32 %v2691_v11, %v1248_v33  ;;  %1790 = vpow2.f32 %v1134_v6  ;;  %v3150_v6 = vsub.f32 %v3108_v25, %v2505_v38 }
 0x34e   : > { %v2810_v43 = vpop.eup %1772  ;;  %1792 = vpow2.f32 %v1138_v29  ;;  %1378 = vmatprep.mubr.bf16.mxu1 %v1343_v54  ;;  %v1162_v29 = vmul.f32 1.442695, %v3151_v44  ;;  %v1174_v44 = vmul.f32 1.442695, %v3154_v35 }
 0x34f   : > { %v2815_v26 = vpop.eup %1774  ;;  %v1250_v61 = vadd.f32 %v2697_v49, %v1249_v57  ;;  %1794 = vpow2.f32 %v1142_v10  ;;  %v1158_v33 = vmul.f32 1.442695, %v3150_v6  ;;  %v3152_v10 = vsub.f32 %v3110_v51, %v2505_v38 }
 0x350   : > { %v2823_v0 = vpop.eup %1776  ;;  %1796 = vpow2.f32 %v1146_v62  ;;  %v3153_v62 = vsub.f32 %v3111_v59, %v2505_v38  ;;  %v3155_v57 = vsub.f32 %v3113_v40, %v2505_v38  ;;  %v3156_v59 = vsub.f32 %v3114_v36, %v2505_v38 }
 0x351   : > { %v1779_v39 = vpop.eup %1778  ;;  %v1251_v14 = vadd.f32 %v2702_v19, %v1250_v61  ;;  %1798 = vpow2.f32 %v1150_v63  ;;  %v1166_v25 = vmul.f32 1.442695, %v3152_v10  ;;  %v3158_v40 = vsub.f32 %v3116_v24, %v2505_v38 }
 0x352   : > { %v1781_v6 = vpop.eup %1780  ;;  %1800 = vpow2.f32 %v1154_v18  ;;  %v1170_v54 = vmul.f32 1.442695, %v3153_v62  ;;  %v1178_v18 = vmul.f32 1.442695, %v3155_v57  ;;  %v1182_v62 = vmul.f32 1.442695, %v3156_v59 }
 0x353   : > { %v1783_v45 = vpop.eup %1782  ;;  %v1252_v63 = vadd.f32 %v2708_v53, %v1251_v14  ;;  %1802 = vpow2.f32 %v1158_v33  ;;  %v1273_v61 = vadd.f32 %v1781_v6, %v1779_v39  ;;  %v1311_v51 = vpack.c.bf16 %v1781_v6, %v1779_v39 }
 0x354   : > { %v1785_v10 = vpop.eup %1784  ;;  %1804 = vpow2.f32 %v1162_v29  ;;  %v3157_v29 = vsub.f32 %v3115_v55, %v2505_v38  ;;  %v1190_v57 = vmul.f32 1.442695, %v3158_v40  ;;  %v3159_v36 = vpack.c.bf16 %v2597_v32, %v2589_v16 }
 0x355   : > { %v1787_v19 = vpop.eup %1786  ;;  %v1253_v15 = vadd.f32 %v2713_v60, %v1252_v63  ;;  %1806 = vpow2.f32 %v1166_v25  ;;  %v1274_v35 = vadd.f32 %v1783_v45, %v1273_v61  ;;  %1346 = vmatprep.subr.bf16.mxu1 %v1311_v51  ;;  %v1313_v14 = vpack.c.bf16 %v1785_v10, %v1783_v45 }
 0x356   : > { %v1789_v33 = vpop.eup %1788  ;;  %1808 = vpow2.f32 %v1170_v54  ;;  %v1186_v39 = vmul.f32 1.442695, %v3157_v29  ;;  %1347 = vmatpush1.bf16.msra.mxu1 %v3159_v36  ;;  %v3160_v55 = vsub.f32 %v3117_v20, %v2505_v38  ;;  %v3161_v24 = vsub.f32 %v3118_v31, %v2505_v38  ;;  %v3166_v36 = vld [vmem:[#allocation28_spill] sm:$0xff] }
 0x357   : > { %v1791_v6 = vpop.eup %1790  ;;  %v1254_v25 = vadd.f32 %v2719_v37, %v1253_v15  ;;  %1810 = vpow2.f32 %v1174_v44  ;;  %v1275_v63 = vadd.f32 %v1785_v10, %v1274_v35  ;;  %1348 = vmatprep.subr.bf16.mxu1 %v1313_v14  ;;  %v1315_v45 = vpack.c.bf16 %v1789_v33, %v1787_v19 }
 0x358   : > { %v1793_v54 = vpop.eup %1792  ;;  %1812 = vpow2.f32 %v1178_v18  ;;  %v1194_v61 = vmul.f32 1.442695, %v3160_v55  ;;  %v1198_v51 = vmul.f32 1.442695, %v3161_v24  ;;  %v3162_v10 = vsub.f32 %v3119_v8, %v2505_v38 }
 0x359   : > { %v1795_v59 = vpop.eup %1794  ;;  %v1255_v16 = vadd.f32 %v2730_v46, %v1254_v25  ;;  %1814 = vpow2.f32 %v1182_v62  ;;  %v1276_v32 = vadd.f32 %v1787_v19, %v1275_v63  ;;  %v1317_v15 = vpack.c.bf16 %v1793_v54, %v1791_v6 }
 0x35a   : > { %v1797_v44 = vpop.eup %1796  ;;  %1816 = vpow2.f32 %v1186_v39  ;;  %v1202_v18 = vmul.f32 1.442695, %v3162_v10  ;;  %v3163_v20 = vsub.f32 %v3120_v7, %v2505_v38  ;;  %v3164_v31 = vpack.c.bf16 %v2613_v47, %v2605_v50 }
 0x35b   : > { %v1799_v14 = vpop.eup %1798  ;;  %v1256_v29 = vadd.f32 %v2739_v27, %v1255_v16  ;;  %1818 = vpow2.f32 %v1190_v57  ;;  %v1277_v19 = vadd.f32 %v1789_v33, %v1276_v32  ;;  %v1319_v62 = vpack.c.bf16 %v1797_v44, %v1795_v59 }
 0x35c   : > { %v1206_v35 = vmul.f32 1.442695, %v3163_v20  ;;  %1349 = vmatpush1.bf16.msra.mxu1 %v3164_v31  ;;  %v1801_v39 = vpop.eup %1800  ;;  %1820 = vpow2.f32 %v1194_v61  ;;  %v3165_v8 = vsub.f32 %v3121_v1, %v2505_v38  ;;  %v3167_v7 = vsub.f32 %v3166_v36, %v2505_v38  ;;  %v3169_v61 = vld [vmem:[#allocation30_spill] sm:$0xff] }
 0x35d   : > { %1350 = vmatprep.subr.bf16.mxu1 %v1315_v45  ;;  %v1803_v63 = vpop.eup %1802  ;;  %v1257_v50 = vadd.f32 %v2750_v42, %v1256_v29  ;;  %1822 = vpow2.f32 %v1198_v51  ;;  %v1278_v47 = vadd.f32 %v1791_v6, %v1277_v19  ;;  %v1321_v55 = vpack.c.bf16 %v1801_v39, %v1799_v14 }
 0x35e   : > { %v1210_v40 = vmul.f32 1.442695, %v3165_v8  ;;  %v1214_v25 = vmul.f32 1.442695, %v3167_v7  ;;  %v1805_v57 = vpop.eup %1804  ;;  %1824 = vpow2.f32 %v1202_v18  ;;  %v3168_v33 = vsub.f32 %v3123_v23, %v2505_v38 }
 0x35f   : > { %v3170_v1 = vsub.f32 %v3169_v61, %v2505_v38  ;;  %v3171_v16 = vpack.c.bf16 %v2628_v28, %v2621_v48  ;;  %v1807_v32 = vpop.eup %1806  ;;  %v1258_v10 = vadd.f32 %v2759_v22, %v1257_v50  ;;  %1826 = vpow2.f32 %v1206_v35 }
 0x360   : > { %v1218_v45 = vmul.f32 1.442695, %v3168_v33  ;;  %v1279_v6 = vadd.f32 %v1793_v54, %v1278_v47  ;;  %v1323_v51 = vpack.c.bf16 %v1805_v57, %v1803_v63  ;;  %v1809_v18 = vpop.eup %1808  ;;  %1828 = vpow2.f32 %v1210_v40  ;;  %v3174_v54 = vld [vmem:[#allocation33_spill] sm:$0xff] }
 0x361   : > { %v1222_v24 = vmul.f32 1.442695, %v3170_v1  ;;  %1351 = vmatpush1.bf16.msra.mxu1 %v3171_v16  ;;  %v3172_v23 = vsub.f32 %v3125_v5, %v2505_v38  ;;  %v3173_v31 = vsub.f32 %v3126_v56, %v2505_v38  ;;  %v1811_v19 = vpop.eup %1810  ;;  %v1259_v28 = vadd.f32 %v2767_v30, %v1258_v10 }
 0x362   : > { %1352 = vmatprep.subr.bf16.mxu1 %v1317_v15  ;;  %1830 = vpow2.f32 %v1214_v25  ;;  %v1280_v48 = vadd.f32 %v1795_v59, %v1279_v6  ;;  %v1325_v8 = vpack.c.bf16 %v1809_v18, %v1807_v32  ;;  %v1813_v35 = vpop.eup %1812  ;;  %v3175_v15 = vsub.f32 %v3174_v54, %v2505_v38 }
 0x363   : > { %v1226_v20 = vmul.f32 1.442695, %v3172_v23  ;;  %v1230_v29 = vmul.f32 1.442695, %v3173_v31  ;;  %1832 = vpow2.f32 %v1218_v45  ;;  %v3176_v5 = vpack.c.bf16 %v2643_v4, %v2636_v12  ;;  %v1815_v36 = vpop.eup %1814 }
 0x364   : > { %v1234_v40 = vmul.f32 1.442695, %v3175_v15  ;;  %v1260_v56 = vadd.f32 %v2774_v21, %v1259_v28  ;;  %1834 = vpow2.f32 %v1222_v24  ;;  %v1281_v7 = vadd.f32 %v1797_v44, %v1280_v48  ;;  %v1817_v25 = vpop.eup %1816 }
 0x365   : > { %1353 = vmatpush1.bf16.msra.mxu1 %v3176_v5  ;;  %v1327_v50 = vpack.c.bf16 %v1813_v35, %v1811_v19  ;;  %1836 = vpow2.f32 %v1226_v20  ;;  %v1819_v59 = vpop.eup %1818  ;;  %v1329_v38 = vpack.c.bf16 %v1817_v25, %v1815_v36  ;;  %v3177_v4 = vpack.c.bf16 %v2658_v58, %v2651_v9 }
 0x366   : > { %1354 = vmatprep.subr.bf16.mxu1 %v1319_v62  ;;  %v1261_v47 = vadd.f32 %v2788_v34, %v1260_v56  ;;  %1838 = vpow2.f32 %v1230_v29  ;;  %v1282_v33 = vadd.f32 %v1799_v14, %v1281_v7  ;;  %v1821_v45 = vpop.eup %1820  ;;  %v3178_v23 = vpack.c.bf16 %v2672_v2, %v2666_v17 }
 0x367   : > { %1840 = vpow2.f32 %v1234_v40  ;;  %v1823_v12 = vpop.eup %1822  ;;  %v1331_v62 = vpack.c.bf16 %v1821_v45, %v1819_v59  ;;  %v3180_v56 = vpack.c.bf16 %v2697_v49, %v2691_v11  ;;  %v3184_v11 = vpack.c.bf16 %v2739_v27, %v2730_v46 }
 0x368   : > { %v1262_v61 = vadd.f32 %v2795_v41, %v1261_v47  ;;  %v1283_v44 = vadd.f32 %v1801_v39, %v1282_v33  ;;  %v1825_v1 = vpop.eup %1824  ;;  %v3181_v47 = vld [vmem:[#allocation13_spill] sm:$0xff] }
 0x369   : > { %1355 = vmatpush1.bf16.msra.mxu1 %v3177_v4  ;;  %v1827_v24 = vpop.eup %1826  ;;  %v1333_v6 = vpack.c.bf16 %v1825_v1, %v1823_v12 }
 0x36a   : > { %1356 = vmatprep.subr.bf16.mxu1 %v1321_v55  ;;  %v1263_v16 = vadd.f32 %v2803_v3, %v1262_v61  ;;  %v1284_v10 = vadd.f32 %v1803_v63, %v1283_v44  ;;  %v1829_v14 = vpop.eup %1828  ;;  %v3179_v63 = vpack.c.bf16 %v2685_v52, %v2678_v13  ;;  %v3182_v13 = vpack.c.bf16 %v2708_v53, %v3181_v47  ;;  %v368_v61 = vld [vmem:[%s2227_s18 + $0x30] sm:$0xff] }
 0x36b   : > { %v1335_v31 = vpack.c.bf16 %v1829_v14, %v1827_v24 }
 0x36c   : > { %v1831_v20 = vpop.eup %1830  ;;  %v1264_v58 = vadd.f32 %v2810_v43, %v1263_v16  ;;  %v1285_v9 = vadd.f32 %v1805_v57, %v1284_v10 }
 0x36d   : > { %1357 = vmatpush1.bf16.msra.mxu1 %v3178_v23  ;;  %v1833_v39 = vpop.eup %1832 }
 0x36e   : > { %1358 = vmatprep.subr.bf16.mxu1 %v1323_v51  ;;  %v1835_v55 = vpop.eup %1834  ;;  %v1265_v29 = vadd.f32 %v2815_v26, %v1264_v58  ;;  %v1286_v28 = vadd.f32 %v1807_v32, %v1285_v9  ;;  %v1337_v48 = vpack.c.bf16 %v1833_v39, %v1831_v20  ;;  %v1402_v58 = vstv %s1399_s11 }
 0x36f   : > { %v1837_v54 = vpop.eup %1836 }
 0x370   : > { %v1839_v15 = vpop.eup %1838  ;;  %v1266_v2 = vadd.f32 %v2823_v0, %v1265_v29  ;;  %v1287_v17 = vadd.f32 %v1809_v18, %v1286_v28  ;;  %v1339_v40 = vpack.c.bf16 %v1837_v54, %v1835_v55  ;;  %v3183_v18 = vpack.c.bf16 %v2719_v37, %v2713_v60 }
 0x371   : > { %1359 = vmatpush1.bf16.msra.mxu1 %v3179_v63  ;;  %v1841_v57 = vpop.eup %1840  ;;  %v3186_v37 = vpack.c.bf16 %v2774_v21, %v2767_v30  ;;  %v367_v21 = vld [vmem:[%s2227_s18 + $0x28] sm:$0xff] }
 0x372   : > { %1360 = vmatprep.subr.bf16.mxu1 %v1325_v8  ;;  %v1288_v51 = vadd.f32 %v1811_v19, %v1287_v17  ;;  %v1341_v5 = vpack.c.bf16 %v1841_v57, %v1839_v15  ;;  %v3190_v17 = vld [vmem:[#allocation14_spill] sm:$0xff] }
 0x374   : > { %v1289_v32 = vadd.f32 %v1813_v35, %v1288_v51  ;;  %v3185_v35 = vpack.c.bf16 %v2759_v22, %v2750_v42  ;;  %v3188_v22 = vpack.c.bf16 %v2810_v43, %v2803_v3  ;;  %v1267_v3 = vrot.slane %v1266_v2, 4 }
 0x375   : > { %1361 = vmatpush1.bf16.msra.mxu1 %v3180_v56 }
 0x376   : > { %1362 = vmatprep.subr.bf16.mxu1 %v1327_v50  ;;  %v1290_v7 = vadd.f32 %v1815_v36, %v1289_v32  ;;  %v3187_v50 = vpack.c.bf16 %v2795_v41, %v2788_v34  ;;  %v3189_v41 = vpack.c.bf16 %v2823_v0, %v2815_v26 }
 0x378   : > { %v1291_v52 = vadd.f32 %v1817_v25, %v1290_v7 }
 0x379   : > { %1363 = vmatpush1.bf16.msra.mxu1 %v3182_v13 }
 0x37a   : > { %1364 = vmatprep.subr.bf16.mxu1 %v1329_v38  ;;  %v1292_v33 = vadd.f32 %v1819_v59, %v1291_v52  ;;  %v362_v59 = vld [vmem:[%s2227_s18] sm:$0xff]  ;;  %v364_v38 = vld [vmem:[%s2227_s18 + $0x10] sm:$0xff] }
 0x37b   : > { %v1342_v4 = vpack.c.bf16 %v364_v38, %v362_v59 }
 0x37c   : > { %v1293_v19 = vadd.f32 %v1821_v45, %v1292_v33  ;;  %v2949_v45 = vld [vmem:[%s2227_s18 + $0x38] sm:$0xff] }
 0x37d   : > { %1365 = vmatpush1.bf16.msra.mxu1 %v3183_v18  ;;  %v1345_v34 = vpack.c.bf16 %v2949_v45, %v367_v21 }
 0x37e   : > { %1366 = vmatprep.subr.bf16.mxu1 %v1331_v62  ;;  %v1294_v8 = vadd.f32 %v1823_v12, %v1293_v19  ;;  %v366_v12 = vld [vmem:[%s2227_s18 + $0x20] sm:$0xff]  ;;  %v1268_v62 = vadd.f32 %v1267_v3, %v1266_v2  ;;  %s2966_s18 = scalar_lea.hbm %s3023_s7, %s1623_s24 }
 0x37f   : > { %v1344_v43 = vpack.c.bf16 %v368_v61, %v366_v12 }
 0x380   : > { %v1295_v49 = vadd.f32 %v1825_v1, %v1294_v8 }
 0x381   : > { %1367 = vmatpush1.bf16.msra.mxu1 %v3184_v11 }
 0x382   : > { %1368 = vmatprep.subr.bf16.mxu1 %v1333_v6  ;;  %v1296_v53 = vadd.f32 %v1827_v24, %v1295_v49  ;;  %v1269_v24 = vrot.slane %v1268_v62, 2 }
 0x384   : > { %v1297_v36 = vadd.f32 %v1829_v14, %v1296_v53  ;;  %v1270_v10 = vadd.f32 %v1269_v24, %v1268_v62 }
 0x385   : > { %1369 = vmatpush1.bf16.msra.mxu1 %v3185_v35 }
 0x386   : > { %1370 = vmatprep.subr.bf16.mxu1 %v1335_v31  ;;  %v1298_v60 = vadd.f32 %v1831_v20, %v1297_v36  ;;  %v1271_v14 = vrot.slane %v1270_v10, 1 }
 0x388   : > { %v1299_v46 = vadd.f32 %v1833_v39, %v1298_v60  ;;  %v1272_v26 = vadd.f32 %v1271_v14, %v1270_v10 }
 0x389   : > { %1371 = vmatpush1.bf16.msra.mxu1 %v3186_v37 }
 0x38a   : > { %1372 = vmatprep.subr.bf16.mxu1 %v1337_v48  ;;  %v1300_v27 = vadd.f32 %v1835_v55, %v1299_v46  ;;  %1842 = vrcp.f32 %v1272_v26 }
 0x38c   : > { %v1301_v25 = vadd.f32 %v1837_v54, %v1300_v27 }
 0x38d   : > { %1373 = vmatpush1.bf16.msra.mxu1 %v3187_v50 }
 0x38e   : > { %1374 = vmatprep.subr.bf16.mxu1 %v1339_v40  ;;  %v1302_v42 = vadd.f32 %v1839_v15, %v1301_v25 }
 0x390   : > { %v1303_v30 = vadd.f32 %v1841_v57, %v1302_v42 }
 0x391   : > { %1375 = vmatpush1.bf16.msra.mxu1 %v3188_v22 }
 0x392   : > { %1376 = vmatprep.subr.bf16.mxu1 %v1341_v5  ;;  %v1304_v44 = vrot.slane %v1303_v30, 4  ;;  %v3191_v5 = vld [vmem:[#allocation15_spill] sm:$0xff] }
 0x394   : > { %v1305_v1 = vadd.f32 %v1304_v44, %v1303_v30  ;;  %v1843_v20 = vpop.eup %1842 }
 0x395   : > { %1377 = vmatpush1.bf16.msra.mxu1 %v3189_v41  ;;  %v1403_v31 = vmul.f32 %v1843_v20, %v1402_v58 }
 0x396   : > { %v1306_v16 = vrot.slane %v1305_v1, 2 }
 0x398   : > { %1379 = vmatmul.mubr.bf16.vlgmr.msra.gmra.mrb[4].mxu1 %v1342_v4  ;;  %v1307_v6 = vadd.f32 %v1306_v16, %v1305_v1 }
 0x399   : > { %1388 = vmatprep.mubr.bf16.mxu1 %v1345_v34 }
 0x39a   : > { %v1308_v23 = vrot.slane %v1307_v6, 1 }
 0x39c   : > { %v1309_v0 = vadd.f32 %v1308_v23, %v1307_v6 }
 0x39e   : > { %1844 = vrcp.f32 %v1309_v0 }
 0x3a0   : > { %1389 = vmatmul.mubr.bf16.gmra.mrb[8].mxu1 %v1344_v43 }
 0x3a8   : > { %v1845_v9 = vpop.eup %1844 }
 0x3a9   : > { %v1404_v55 = vmul.f32 %v1845_v9, %v1402_v58 }
 0x46b   : > { %v1380_v39 = vpop.f32.mrb[4].mxu1 }
 0x46c   : > { %v1415_v29 = vmul.f32 %v1403_v31, %v1380_v39  ;;  %v1382_v28 = vpop.f32.mrb[5].mxu1 }
 0x46d   : > { %v1416_v48 = vmul.f32 %v1404_v55, %v1382_v28  ;;  %v1384_v54 = vpop.f32.mrb[6].mxu1 }
 0x46e   : > { %v1423_v63 = vadd.f32 %v1415_v29, %v362_v59  ;;  %v1417_v15 = vmul.f32 %v1403_v31, %v1384_v54  ;;  %v1386_v2 = vpop.f32.mrb[7].mxu1 }
 0x46f   : > { %v1424_v40 = vadd.f32 %v1416_v48, %v3190_v17  ;;  %v1418_v57 = vmul.f32 %v1404_v55, %v1386_v2 }
 0x470   : > { %1431 = vst [vmem:[%s351_s25] sm:$0xff] %v1423_v63  ;;  %v1425_v51 = vadd.f32 %v1417_v15, %v364_v38 }
 0x471   : > { %1432 = vst [vmem:[%s351_s25 + $0x8] sm:$0xff] %v1424_v40  ;;  %v1426_v56 = vadd.f32 %v1418_v57, %v3191_v5 }
 0x472   : > { %1433 = vst [vmem:[%s351_s25 + $0x10] sm:$0xff] %v1425_v51 }
 0x473   : > { %1434 = vst [vmem:[%s351_s25 + $0x18] sm:$0xff] %v1426_v56  ;;  %v1390_v32 = vpop.f32.mrb[8].mxu1 }
 0x474   : > { %v1419_v7 = vmul.f32 %v1403_v31, %v1390_v32  ;;  %v1392_v47 = vpop.f32.mrb[9].mxu1 }
 0x475   : > { %v1420_v13 = vmul.f32 %v1404_v55, %v1392_v47  ;;  %v1394_v52 = vpop.f32.mrb[10].mxu1 }
 0x476   : > { %v1427_v33 = vadd.f32 %v1419_v7, %v366_v12  ;;  %v1421_v18 = vmul.f32 %v1403_v31, %v1394_v52  ;;  %v1396_v19 = vpop.f32.mrb[11].mxu1 }
 0x477   : > { %v1428_v8 = vadd.f32 %v1420_v13, %v367_v21  ;;  %v1422_v11 = vmul.f32 %v1404_v55, %v1396_v19 }
 0x478   : > { %1435 = vst [vmem:[%s351_s25 + $0x20] sm:$0xff] %v1427_v33  ;;  %v1429_v49 = vadd.f32 %v1421_v18, %v368_v61 }
 0x479   : > { %1436 = vst [vmem:[%s351_s25 + $0x28] sm:$0xff] %v1428_v8  ;;  %v1430_v53 = vadd.f32 %v1422_v11, %v2949_v45 }
 0x47a   : > { %1437 = vst [vmem:[%s351_s25 + $0x30] sm:$0xff] %v1429_v49 }
 0x47b   : > { %1438 = vst [vmem:[%s351_s25 + $0x38] sm:$0xff] %v1430_v53 }
 0x47c   : > { %1919 = shalt.err (!%p1916_p11)
}
 0x47d   : > { %s1920_s23 = scalar_lea.hbm %s2966_s18, 1024  ;;  %s1924_s20 = scalar_lea.hbm %s3023_s7, 2048 }
 0x47e   : > { %p1921_p1 = scmp.ne.s32.totalorder %s2966_s18, %s1920_s23  ;;  %p1925_p5 = scmp.lt.u32.totalorder %s2966_s18, %s3023_s7 }
 0x47f   : > { %p1926_p4 = scmp.lt.u32.totalorder %s1924_s20, %s1920_s23  ;;  %p1928_p0 = scmp.lt.u32.totalorder %s1920_s23, %s2966_s18 }
 0x480   : > { %p1922_p6 = pnand %p1921_p1, %p3192_p3 }
 0x481   : > { %p1927_p8 = por %p1926_p4, %p1925_p5 }
 0x482   : > { %p1923_p2 = pneg %p1922_p6 }
 0x483   : > { %p1929_p12 = por %p1928_p0, %p1927_p8 }
 0x485   : > { %p1930_p13 = pnand %p1929_p12, %p1923_p2 }
 0x487   : > { %1933 = shalt.err (!%p1930_p13)
}
 0x488   : > { %s2001_s24 = smov 256   ;;  %s2002_s19 = smov 16  }
 0x489   : > { %1644 = dma.vmem_to_hbm [thread:$0]  (%p3192_p3), %s2961_s6, 1024, %s2966_s18, %s1440_s29, %s2001_s24, %s2001_s24, %s2002_s19  }
 0x48a PF: > { %s1470_s10 = sand.u32 1, %s1972_s26   ;;  %p3193_p7 = scmp.ne.s32.totalorder %s3078_s17, 0 }
 0x48b   : > { %p3194_p10 = scmp.ge.s32.totalorder %s1992_s8, 2  ;;  %s1471_s14 = scalar_lea.sflag [#allocation5], %s1470_s10 }
 0x48d   : > { %p1654_p9 = pnand %p3194_p10, %p3193_p7 }
 0x48f   : > { %1967 = dma.done.wait (!%p1654_p9), %s1471_s14, 1024  }
 0x490   : > { %1969 = vsyncadd (!%p1654_p9), %s1471_s14, 4294966272  ;;  %s27_s8 = sadd.s32 1, %s1992_s8   ;;  %s3195_s15 = sld [smem:[#allocation12_spill]] }
 0x491   : > { %p24_p11 = scmp.ge.s32.totalorder %s27_s8, 4   ;;  %s3196_s26 = smov %s1976_s27 }
 0x492   : > { %s3197_s27 = smov %s1980_s28  ;;  %s3198_s28 = smov %s2102_s16 }
 0x493   : > { %s3199_s29 = smov %s1988_s30  ;;  %26 = sbr.rel (!%p24_p11) target bundleno = 11 (0xb), region = 108 }
 0x496   : > { %s3200_s30 = smov %s3195_s15 }
 0x49a   :  { %1476 = vsyncpa [#allocation4], 1 }
 0x49b   :  { %1478 = vsyncpa [#allocation4 + $0x1], 1 }
 0x49c   :  { %1479 = vsyncpa [#allocation7], 1 }
 0x49d   :  { %1481 = vsyncpa [#allocation7 + $0x1], 1 }
 0x49e   :  { %1482 = vsyncpa [#allocation5], 1 }
 0x49f   :  { %1484 = vsyncpa [#allocation5 + $0x1], 1 }

</bundles_post_ra>
